<compile_context>
chip_gen: v7x
topology: tpu7x:2x2x1
jax: 0.10.0
libtpu: 0.0.40
codegen_flags: <defaults>
</compile_context>

<pallas_src>
import jax
import jax.numpy as jnp
from jax import lax
from jax.experimental import pallas as pl
from jax.experimental.pallas import tpu as pltpu  # noqa: F401  (TPU backend)


def _relu(v):
    return jnp.maximum(v, jnp.array(0, dtype=v.dtype))


def _interleave_selectors(n, dtype):
    """0/1 matrices S0, S1 of shape (n, 2n) with S0[b, 2b] = 1, S1[b, 2b+1] = 1.

    (a @ S0 + b @ S1) interleaves a and b along the lane axis:
    result[:, 2k] = a[:, k], result[:, 2k+1] = b[:, k].
    """
    col = lax.broadcasted_iota(jnp.int32, (n, 2 * n), 1)
    row = lax.broadcasted_iota(jnp.int32, (n, 2 * n), 0)
    one = jnp.array(1, dtype=dtype)
    zero = jnp.array(0, dtype=dtype)
    s0 = jnp.where(col == 2 * row, one, zero)
    s1 = jnp.where(col == 2 * row + 1, one, zero)
    return s0, s1


def _interleave_lanes(a, b):
    """Exact lane interleave of two (M, N) arrays -> (M, 2N) via MXU selection matmul."""
    n = a.shape[1]
    s0, s1 = _interleave_selectors(n, a.dtype)
    return (
        jnp.dot(a, s0, preferred_element_type=jnp.float32,
                precision=lax.Precision.HIGHEST)
        + jnp.dot(b, s1, preferred_element_type=jnp.float32,
                  precision=lax.Precision.HIGHEST)
    )


# ---------------- fused kernel ----------------

def fused_stack_relu_kernel(x_ref, y_ref, z_ref, w_ref,
                            o0_ref, o1_ref, o2_ref, o3_ref):
    # Load each operand once; ReLU once per operand (VPU).
    rx = _relu(x_ref[...])          # (A, B)
    ry = _relu(y_ref[...])          # (A, B)
    rz = _relu(z_ref[...])          # (C*D, E)
    rw = _relu(w_ref[...])          # (C*D, E)

    # out0 = stack((x, y), dim=0): contiguous slab stores (already lane-dense).
    o0_ref[0] = rx
    o0_ref[1] = ry

    # out1 = stack((x, y), dim=2), lane-dense as (A, 2B): interleave along
    # lanes on the MXU, single unmasked store.  Wrapper reshape -> (A, B, 2).
    o1_ref[...] = _interleave_lanes(rx, ry).astype(o1_ref.dtype)

    # out2 = stack((z, w), dim=2), lane-dense as (C*D, 2E): two contiguous
    # lane slabs.  Wrapper reshape -> (C, D, 2, E).
    e = rz.shape[1]
    o2_ref[:, :e] = rz
    o2_ref[:, e:] = rw

    # out3 = stack((z, w), dim=-1), lane-dense as (C*D, 2E): lane interleave,
    # single unmasked store.  Wrapper reshape -> (C, D, E, 2).
    o3_ref[...] = _interleave_lanes(rz, rw).astype(o3_ref.dtype)


# ---------------- wrapper ----------------

@jax.jit
def model_forward(x, y, z, w):
    A, B = x.shape
    C, D, E = z.shape

    # Contiguous (row-major) collapses — metadata only.
    z2 = z.reshape(C * D, E)
    w2 = w.reshape(C * D, E)

    out0, o1_flat, o2_flat, o3_flat = pl.pallas_call(
        fused_stack_relu_kernel,
        out_shape=(
            jax.ShapeDtypeStruct((2, A, B), x.dtype),        # out0
            jax.ShapeDtypeStruct((A, 2 * B), x.dtype),       # out1 (lane-dense)
            jax.ShapeDtypeStruct((C * D, 2 * E), z.dtype),   # out2 (lane-dense)
            jax.ShapeDtypeStruct((C * D, 2 * E), z.dtype),   # out3 (lane-dense)
        ),
        # No grid / no BlockSpecs: full-array blocks resident in VMEM,
        # single kernel invocation (inputs are small).
    )(x, y, z2, w2)

    # Contiguous reshapes back to torch.stack's exact output shapes (free).
    out1 = o1_flat.reshape(A, B, 2)
    out2 = o2_flat.reshape(C, D, 2, E)
    out3 = o3_flat.reshape(C, D, E, 2)
    return out0, out1, out2, out3


# ---------------- reference (plain JAX) ----------------

def model_forward_ref(x, y, z, w):
    out0 = jnp.maximum(jnp.stack((x, y), axis=0), 0.0)
    out1 = jnp.maximum(jnp.stack((x, y), axis=2), 0.0)
    out2 = jnp.maximum(jnp.stack((z, w), axis=2), 0.0)
    out3 = jnp.maximum(jnp.stack((z, w), axis=-1), 0.0)
    return out0, out1, out2, out3


if __name__ == "__main__":
    key = jax.random.PRNGKey(0)
    kx, ky, kz, kw = jax.random.split(key, 4)
    # small, layout-friendly shapes; mixed signs so ReLU is exercised
    x = jax.random.normal(kx, (8, 128), dtype=jnp.float32)
    y = jax.random.normal(ky, (8, 128), dtype=jnp.float32)
    z = jax.random.normal(kz, (4, 8, 128), dtype=jnp.float32)
    w = jax.random.normal(kw, (4, 8, 128), dtype=jnp.float32)

    outs = jax.block_until_ready(model_forward(x, y, z, w))
    refs = model_forward_ref(x, y, z, w)
    for o, r in zip(outs, refs):
        assert o.shape == r.shape, (o.shape, r.shape)
        assert o.dtype == r.dtype, (o.dtype, r.dtype)
        assert jnp.allclose(o, r, atol=1e-5, rtol=1e-5), "mismatch vs reference"

    print("KERNEL_OK")
</pallas_src>

<mosaic_0001>
module attributes {stable_mosaic.version = 11 : i64} {
  func.func @fused_stack_relu_kernel(%arg0: memref<8x128xf32, #tpu.memory_space<vmem>>, %arg1: memref<8x128xf32, #tpu.memory_space<vmem>>, %arg2: memref<32x128xf32, #tpu.memory_space<vmem>>, %arg3: memref<32x128xf32, #tpu.memory_space<vmem>>, %arg4: memref<2x8x128xf32, #tpu.memory_space<vmem>>, %arg5: memref<8x256xf32, #tpu.memory_space<vmem>>, %arg6: memref<32x256xf32, #tpu.memory_space<vmem>>, %arg7: memref<32x256xf32, #tpu.memory_space<vmem>>) attributes {dimension_semantics = [], scalar_prefetch = 0 : i64, scratch_operands = 0 : i64, tpu.core_type = #tpu.core_type<tc>} {
    %c0 = arith.constant 0 : index
    %c0_0 = arith.constant 0 : index
    %0 = vector.load %arg0[%c0, %c0_0] : memref<8x128xf32, #tpu.memory_space<vmem>>, vector<8x128xf32>
    %cst = arith.constant 0.000000e+00 : f32
    %1 = vector.broadcast %cst : f32 to vector<8x128xf32>
    %2 = arith.maximumf %0, %1 : vector<8x128xf32>
    %c0_1 = arith.constant 0 : index
    %c0_2 = arith.constant 0 : index
    %3 = vector.load %arg1[%c0_1, %c0_2] : memref<8x128xf32, #tpu.memory_space<vmem>>, vector<8x128xf32>
    %cst_3 = arith.constant 0.000000e+00 : f32
    %4 = vector.broadcast %cst_3 : f32 to vector<8x128xf32>
    %5 = arith.maximumf %3, %4 : vector<8x128xf32>
    %c0_4 = arith.constant 0 : index
    %c0_5 = arith.constant 0 : index
    %6 = vector.load %arg2[%c0_4, %c0_5] : memref<32x128xf32, #tpu.memory_space<vmem>>, vector<32x128xf32>
    %cst_6 = arith.constant 0.000000e+00 : f32
    %7 = vector.broadcast %cst_6 : f32 to vector<32x128xf32>
    %8 = arith.maximumf %6, %7 : vector<32x128xf32>
    %c0_7 = arith.constant 0 : index
    %c0_8 = arith.constant 0 : index
    %9 = vector.load %arg3[%c0_7, %c0_8] : memref<32x128xf32, #tpu.memory_space<vmem>>, vector<32x128xf32>
    %cst_9 = arith.constant 0.000000e+00 : f32
    %10 = vector.broadcast %cst_9 : f32 to vector<32x128xf32>
    %11 = arith.maximumf %9, %10 : vector<32x128xf32>
    %c0_10 = arith.constant 0 : index
    %c0_11 = arith.constant 0 : index
    %c0_12 = arith.constant 0 : index
    %12 = vector.load %arg4[%c0_10, %c0_11, %c0_12] : memref<2x8x128xf32, #tpu.memory_space<vmem>>, vector<1x8x128xf32>
    %13 = vector.shape_cast %12 : vector<1x8x128xf32> to vector<8x128xf32>
    %14 = vector.shape_cast %2 : vector<8x128xf32> to vector<1x8x128xf32>
    tpu.vector_store %arg4[%c0_10, %c0_11, %c0_12], %14 {strides = array<i32>} : memref<2x8x128xf32, #tpu.memory_space<vmem>>, vector<1x8x128xf32>,
    %c1 = arith.constant 1 : index
    %c0_13 = arith.constant 0 : index
    %c0_14 = arith.constant 0 : index
    %15 = vector.load %arg4[%c1, %c0_13, %c0_14] : memref<2x8x128xf32, #tpu.memory_space<vmem>>, vector<1x8x128xf32>
    %16 = vector.shape_cast %15 : vector<1x8x128xf32> to vector<8x128xf32>
    %17 = vector.shape_cast %5 : vector<8x128xf32> to vector<1x8x128xf32>
    tpu.vector_store %arg4[%c1, %c0_13, %c0_14], %17 {strides = array<i32>} : memref<2x8x128xf32, #tpu.memory_space<vmem>>, vector<1x8x128xf32>,
    %18 = tpu.iota {dimensions = array<i32: 1>} : vector<128x256xi32>
    %19 = tpu.iota {dimensions = array<i32: 0>} : vector<128x256xi32>
    %c2_i32 = arith.constant 2 : i32
    %20 = vector.broadcast %c2_i32 : i32 to vector<128x256xi32>
    %21 = arith.muli %20, %19 : vector<128x256xi32>
    %22 = arith.cmpi eq, %18, %21 : vector<128x256xi32>
    %cst_15 = arith.constant 1.000000e+00 : f32
    %cst_16 = arith.constant 0.000000e+00 : f32
    %23 = vector.broadcast %cst_15 : f32 to vector<128x256xf32>
    %24 = vector.broadcast %cst_16 : f32 to vector<128x256xf32>
    %25 = arith.select %22, %23, %24 : vector<128x256xi1>, vector<128x256xf32>
    %c2_i32_17 = arith.constant 2 : i32
    %26 = vector.broadcast %c2_i32_17 : i32 to vector<128x256xi32>
    %27 = arith.muli %26, %19 : vector<128x256xi32>
    %c1_i32 = arith.constant 1 : i32
    %28 = vector.broadcast %c1_i32 : i32 to vector<128x256xi32>
    %29 = arith.addi %27, %28 : vector<128x256xi32>
    %30 = arith.cmpi eq, %18, %29 : vector<128x256xi32>
    %cst_18 = arith.constant 1.000000e+00 : f32
    %cst_19 = arith.constant 0.000000e+00 : f32
    %31 = vector.broadcast %cst_18 : f32 to vector<128x256xf32>
    %32 = vector.broadcast %cst_19 : f32 to vector<128x256xf32>
    %33 = arith.select %30, %31, %32 : vector<128x256xi1>, vector<128x256xf32>
    %cst_20 = arith.constant dense<0.000000e+00> : vector<8x256xf32>
    %34 = tpu.matmul %2, %25, %cst_20 {dimension_numbers = #tpu.dot_dimension_numbers<[1], [0], [0], [1], [0, 0, 1, 1], [], []>, precision = #tpu.contract_precision<fp32>} : vector<8x128xf32>, vector<128x256xf32>, vector<8x256xf32> -> vector<8x256xf32>
    %cst_21 = arith.constant dense<0.000000e+00> : vector<8x256xf32>
    %35 = tpu.matmul %5, %33, %cst_21 {dimension_numbers = #tpu.dot_dimension_numbers<[1], [0], [0], [1], [0, 0, 1, 1], [], []>, precision = #tpu.contract_precision<fp32>} : vector<8x128xf32>, vector<128x256xf32>, vector<8x256xf32> -> vector<8x256xf32>
    %36 = arith.addf %34, %35 : vector<8x256xf32>
    %c0_22 = arith.constant 0 : index
    %c0_23 = arith.constant 0 : index
    %37 = vector.load %arg5[%c0_22, %c0_23] : memref<8x256xf32, #tpu.memory_space<vmem>>, vector<8x256xf32>
    tpu.vector_store %arg5[%c0_22, %c0_23], %36 {strides = array<i32>} : memref<8x256xf32, #tpu.memory_space<vmem>>, vector<8x256xf32>,
    %c0_24 = arith.constant 0 : index
    %c0_25 = arith.constant 0 : index
    %38 = vector.load %arg6[%c0_24, %c0_25] : memref<32x256xf32, #tpu.memory_space<vmem>>, vector<32x128xf32>
    tpu.vector_store %arg6[%c0_24, %c0_25], %8 {strides = array<i32>} : memref<32x256xf32, #tpu.memory_space<vmem>>, vector<32x128xf32>,
    %c0_26 = arith.constant 0 : index
    %c128 = arith.constant 128 : index
    %39 = vector.load %arg6[%c0_26, %c128] : memref<32x256xf32, #tpu.memory_space<vmem>>, vector<32x128xf32>
    tpu.vector_store %arg6[%c0_26, %c128], %11 {strides = array<i32>} : memref<32x256xf32, #tpu.memory_space<vmem>>, vector<32x128xf32>,
    %40 = tpu.iota {dimensions = array<i32: 1>} : vector<128x256xi32>
    %41 = tpu.iota {dimensions = array<i32: 0>} : vector<128x256xi32>
    %c2_i32_27 = arith.constant 2 : i32
    %42 = vector.broadcast %c2_i32_27 : i32 to vector<128x256xi32>
    %43 = arith.muli %42, %41 : vector<128x256xi32>
    %44 = arith.cmpi eq, %40, %43 : vector<128x256xi32>
    %cst_28 = arith.constant 1.000000e+00 : f32
    %cst_29 = arith.constant 0.000000e+00 : f32
    %45 = vector.broadcast %cst_28 : f32 to vector<128x256xf32>
    %46 = vector.broadcast %cst_29 : f32 to vector<128x256xf32>
    %47 = arith.select %44, %45, %46 : vector<128x256xi1>, vector<128x256xf32>
    %c2_i32_30 = arith.constant 2 : i32
    %48 = vector.broadcast %c2_i32_30 : i32 to vector<128x256xi32>
    %49 = arith.muli %48, %41 : vector<128x256xi32>
    %c1_i32_31 = arith.constant 1 : i32
    %50 = vector.broadcast %c1_i32_31 : i32 to vector<128x256xi32>
    %51 = arith.addi %49, %50 : vector<128x256xi32>
    %52 = arith.cmpi eq, %40, %51 : vector<128x256xi32>
    %cst_32 = arith.constant 1.000000e+00 : f32
    %cst_33 = arith.constant 0.000000e+00 : f32
    %53 = vector.broadcast %cst_32 : f32 to vector<128x256xf32>
    %54 = vector.broadcast %cst_33 : f32 to vector<128x256xf32>
    %55 = arith.select %52, %53, %54 : vector<128x256xi1>, vector<128x256xf32>
    %cst_34 = arith.constant dense<0.000000e+00> : vector<32x256xf32>
    %56 = tpu.matmul %8, %47, %cst_34 {dimension_numbers = #tpu.dot_dimension_numbers<[1], [0], [0], [1], [0, 0, 1, 1], [], []>, precision = #tpu.contract_precision<fp32>} : vector<32x128xf32>, vector<128x256xf32>, vector<32x256xf32> -> vector<32x256xf32>
    %cst_35 = arith.constant dense<0.000000e+00> : vector<32x256xf32>
    %57 = tpu.matmul %11, %55, %cst_35 {dimension_numbers = #tpu.dot_dimension_numbers<[1], [0], [0], [1], [0, 0, 1, 1], [], []>, precision = #tpu.contract_precision<fp32>} : vector<32x128xf32>, vector<128x256xf32>, vector<32x256xf32> -> vector<32x256xf32>
    %58 = arith.addf %56, %57 : vector<32x256xf32>
    %c0_36 = arith.constant 0 : index
    %c0_37 = arith.constant 0 : index
    %59 = vector.load %arg7[%c0_36, %c0_37] : memref<32x256xf32, #tpu.memory_space<vmem>>, vector<32x256xf32>
    tpu.vector_store %arg7[%c0_36, %c0_37], %58 {strides = array<i32>} : memref<32x256xf32, #tpu.memory_space<vmem>>, vector<32x256xf32>,
    return
  }
}

</mosaic_0001>

<bundles_post_ra>
// kernel: model_forward.1
= control target key start
LH: loop header
LB: loop body
LE: loop exit
PB: predicated region body
PF: predicated region fallthrough
CT: control target
= control target key end

     0   :  { %13 = vsyncpa [#allocation3], 0  ;;  %s6811_s0 = inlined_call_operand.hbm [shape: f32[8,128], index: 0, kind: input, shape index: {}]   ;;  %s6812_s1 = inlined_call_operand.vmem [shape: f32[8,128], index: 1, kind: input, shape index: {}]   ;;  %s6813_s2 = inlined_call_operand.hbm [shape: f32[32,128], index: 2, kind: input, shape index: {}]   ;;  %s6814_s3 = inlined_call_operand.hbm [shape: f32[32,128], index: 3, kind: input, shape index: {}]   ;;  %s6815_s4 = inlined_call_operand.hbm [shape: f32[2,8,128], index: 4, kind: output, shape index: {0}]   ;;  %s6816_s5 = inlined_call_operand.vmem [shape: f32[8,256], index: 5, kind: output, shape index: {1}]   ;;  %s6817_s6 = inlined_call_operand.vmem [shape: f32[32,256], index: 6, kind: output, shape index: {2}]   ;;  %s6818_s7 = inlined_call_operand.vmem [shape: f32[32,256], index: 7, kind: output, shape index: {3}]  }
   0x1   :  { %14 = vsyncpa [#allocation6], 0 }
   0x2   :  { %15 = vsyncpa [#allocation4], 0  ;;  %s4622_s24 = smov [#allocation5]   ;;  %s4528_s28 = scalar_lea.hbm %s6813_s2, 512 }
   0x3   :  { %s33_s25 = sshll.u32 %s4622_s24, 4  ;;  %p4529_p0 = scmp.ne.s32.totalorder %s6813_s2, %s4528_s28  ;;  %s34_s25 = int_to_ptr.vmem [resolvable:$true] %s33_s25 }
   0x4   :  { %p4532_p1 = scmp.lt.u32.totalorder %s4528_s28, %s6813_s2 }
   0x6   :  { %p4534_p2 = pnand %p4532_p1, %p4529_p0 }
   0x8   :  { %4537 = shalt.err (!%p4534_p2)
}
   0x9   :  { %s4538_s10 = scalar_lea.vmem %s34_s25, 512  ;;  %p4543_p4 = scmp.lt.s32.totalorder %s34_s25, %s34_s25 }
   0xa   :  { %p4539_p3 = scmp.ne.s32.totalorder %s34_s25, %s4538_s10  ;;  %p4544_p5 = scmp.lt.s32.totalorder %s4538_s10, %s4538_s10 }
   0xc   :  { %p4545_p6 = por %p4544_p5, %p4543_p4 }
   0xe   :  { %p4546_p7 = pnand %p4545_p6, %p4539_p3 }
  0x10   :  { %4549 = shalt.err (!%p4546_p7)
}
  0x11   :  { %s4623_s11 = smov 128   ;;  %s4624_s12 = smov 8  }
  0x12   :  { %39 = dma.hbm_to_vmem [thread:$0]  %s6813_s2, 512, %s34_s25, [#allocation6], %s4623_s11, %s4623_s11, %s4624_s12  }
  0x13   :  { %s4625_s15 = smov [#allocation2]   ;;  %s4626_s17 = smov [#allocation7]  }
  0x14   :  { %s22_s16 = sshll.u32 %s4625_s15, 4  ;;  %s45_s18 = sshll.u32 %s4626_s17, 4  ;;  %s23_s16 = int_to_ptr.vmem [resolvable:$true] %s22_s16  ;;  %s46_s18 = int_to_ptr.vmem [resolvable:$true] %s45_s18 }
  0x15   :  { %s4550_s21 = scalar_lea.hbm %s6811_s0, 128 }
  0x16   :  { %p4551_p8 = scmp.ne.s32.totalorder %s6811_s0, %s4550_s21  ;;  %p4554_p9 = scmp.lt.u32.totalorder %s4550_s21, %s6811_s0 }
  0x18   :  { %p4556_p10 = pnand %p4554_p9, %p4551_p8 }
  0x1a   :  { %4559 = shalt.err (!%p4556_p10)
}
  0x1b   :  { %s4560_s2 = scalar_lea.vmem %s23_s16, 128  ;;  %p4565_p12 = scmp.lt.s32.totalorder %s23_s16, %s23_s16 }
  0x1c   :  { %p4561_p11 = scmp.ne.s32.totalorder %s23_s16, %s4560_s2  ;;  %p4566_p13 = scmp.lt.s32.totalorder %s4560_s2, %s4560_s2 }
  0x1e   :  { %p4567_p0 = por %p4566_p13, %p4565_p12 }
  0x20   :  { %p4568_p1 = pnand %p4567_p0, %p4561_p11 }
  0x22   :  { %4571 = shalt.err (!%p4568_p1)
}
  0x23   :  { %25 = dma.hbm_to_vmem [thread:$0]  %s6811_s0, 128, %s23_s16, [#allocation3]  }
  0x24   :  { %s4572_s30 = scalar_lea.hbm %s6814_s3, 512 }
  0x25   :  { %p4573_p2 = scmp.ne.s32.totalorder %s6814_s3, %s4572_s30  ;;  %p4576_p3 = scmp.lt.u32.totalorder %s4572_s30, %s6814_s3 }
  0x27   :  { %p4578_p4 = pnand %p4576_p3, %p4573_p2 }
  0x29   :  { %4581 = shalt.err (!%p4578_p4)
}
  0x2a   :  { %s4582_s14 = scalar_lea.vmem %s46_s18, 512  ;;  %p4587_p6 = scmp.lt.s32.totalorder %s46_s18, %s46_s18 }
  0x2b   :  { %p4583_p5 = scmp.ne.s32.totalorder %s46_s18, %s4582_s14  ;;  %p4588_p7 = scmp.lt.s32.totalorder %s4582_s14, %s4582_s14 }
  0x2d   :  { %p4589_p8 = por %p4588_p7, %p4587_p6 }
  0x2f   :  { %p4590_p9 = pnand %p4589_p8, %p4583_p5 }
  0x31   :  { %4593 = shalt.err (!%p4590_p9)
}
  0x32   :  { %51 = dma.hbm_to_vmem [thread:$0]  %s6814_s3, 512, %s46_s18, [#allocation6], %s4623_s11, %s4623_s11, %s4624_s12  }
  0x33   :  { %4616 = dma.done.wait [#allocation3], 128  }
  0x34   :  { %4617 = vsyncadd [#allocation3], 4294967168  ;;  %v84_v0 = vlaneseq }
  0x35   :  { %4618 = dma.done.wait [#allocation6], 1024  }
  0x36   :  { %4619 = vsyncadd [#allocation6], 4294966272  ;;  %v6829_v1 = vmov 0.0   ;;  %v4714_v2 = vand.u32 127, %v84_v0  ;;  %v4716_v3 = vshrl.u32 %v84_v0, 7  ;;  %v7020_v37 = vmov 0 }
  0x37   :  { %328 = vmatprep.mubr.f32.mxu0 %v6829_v1  ;;  %1664 = vmatprep.mubr.f32.mxu1 %v6829_v1  ;;  %v6821_v31 = vmov 1.0|1.0   ;;  %v7024_v45 = vmov 0  ;;  %v7027_v50 = vmov 0  ;;  %v7030_v55 = vmov 0 }
  0x38   :  { %7008 = vst [vmem:[#allocation12_spill] sm:$0xff] %v4714_v2  ;;  %v4719_v4 = vadd.s32 128, %v4714_v2  ;;  %v89_v5 = vadd.s32 8, %v4716_v3  ;;  %v4723_v6 = vmul.u32 2, %v4716_v3  ;;  %v90_v7 = vadd.s32 16, %v4716_v3 }
  0x39   :  { %v91_v8 = vadd.s32 24, %v4716_v3  ;;  %v92_v9 = vadd.s32 32, %v4716_v3  ;;  %v93_v10 = vadd.s32 40, %v4716_v3  ;;  %v94_v11 = vadd.s32 48, %v4716_v3 }
  0x3a   :  { %7009 = vst [vmem:[#allocation13_spill] sm:$0xff] %v4719_v4  ;;  %7010 = vst [vmem:[#allocation14_spill] sm:$0xff] %v4723_v6  ;;  %v4730_v12 = vmul.u32 2, %v89_v5  ;;  %v184_v13 = vadd.s32 1, %v4723_v6  ;;  %v4733_v14 = vmul.u32 2, %v90_v7  ;;  %v4736_v15 = vadd.s32 56, %v4716_v3 }
  0x3b   :  { %v4738_v16 = vmul.u32 2, %v91_v8  ;;  %v4740_v17 = vmul.u32 2, %v92_v9  ;;  %v4743_v18 = vadd.s32 64, %v4716_v3  ;;  %v4746_v19 = vadd.s32 72, %v4716_v3 }
  0x3c   :  { %7011 = vst [vmem:[#allocation15_spill] sm:$0xff] %v4730_v12  ;;  %7012 = vst [vmem:[#allocation16_spill] sm:$0xff] %v4733_v14  ;;  %v185_v20 = vadd.s32 1, %v4730_v12  ;;  %vm201_vm0 = vcmp.eq.s32.totalorder %v4719_v4, %v184_v13  ;;  %vm200_vm1 = vcmp.eq.s32.totalorder %v4714_v2, %v184_v13  ;;  %v186_v21 = vadd.s32 1, %v4733_v14 }
  0x3d   :  { %7013 = vst [vmem:[#allocation17_spill] sm:$0xff] %v4738_v16  ;;  %7014 = vst [vmem:[#allocation18_spill] sm:$0xff] %v4740_v17  ;;  %v233_v22 = vsel %vm201_vm0, 1.0, %v6829_v1  ;;  %v232_v23 = vsel %vm200_vm1, 1.0, %v6829_v1  ;;  %v187_v24 = vadd.s32 1, %v4738_v16  ;;  %v4757_v25 = vmul.u32 2, %v93_v10 }
  0x3e   :  { %vm203_vm2 = vcmp.eq.s32.totalorder %v4719_v4, %v185_v20  ;;  %v4760_v26 = vsub.f32 %v233_v22, %v233_v22  ;;  %vm202_vm3 = vcmp.eq.s32.totalorder %v4714_v2, %v185_v20  ;;  %v4763_v27 = vsub.f32 %v232_v23, %v232_v23 }
  0x3f   :  { %7015 = vst [vmem:[#allocation19_spill] sm:$0xff] %v4757_v25  ;;  %v235_v28 = vsel %vm203_vm2, 1.0, %v6829_v1  ;;  %vm4766_vm4 = vmpackc.low %vm203_vm2, %vm201_vm0  ;;  %v234_v30 = vsel %vm202_vm3, 1.0, %v6829_v1  ;;  %vm205_vm5 = vcmp.eq.s32.totalorder %v4719_v4, %v186_v21  ;;  %vm207_vm6 = vcmp.eq.s32.totalorder %v4719_v4, %v187_v24 }
  0x40   :  { %3643 = vmatprep.subr.msk.bf16.mxu0 %vm4766_vm4, %v6821_v31  ;;  %v4776_v32 = vsub.f32 %v235_v28, %v235_v28  ;;  %4027 = vmatprep.subr.msk.bf16.mxu1 %vm4766_vm4, %v6821_v31  ;;  %vm4783_vm7 = vmpackc.low %vm202_vm3, %vm200_vm1  ;;  %v4787_v34 = vsub.f32 %v234_v30, %v234_v30  ;;  %v237_v35 = vsel %vm205_vm5, 1.0, %v6829_v1  ;;  %v239_v36 = vsel %vm207_vm6, 1.0, %v6829_v1 }
  0x41   :  { %3645 = vmatpush1.bf16.msk.msra.mxu0 %vm4783_vm7, %v6821_v31  ;;  %4029 = vmatpush1.bf16.msk.msra.mxu1 %vm4783_vm7, %v6821_v31  ;;  %vm4797_vm8 = vmpackc.low %vm207_vm6, %vm205_vm5  ;;  %v4801_v38 = vsub.f32 %v237_v35, %v237_v35  ;;  %v4803_v39 = vsub.f32 %v239_v36, %v239_v36  ;;  %vm204_vm9 = vcmp.eq.s32.totalorder %v4714_v2, %v186_v21  ;;  %v188_v40 = vadd.s32 1, %v4740_v17  ;;  %v7140_v29 = vld [vmem:[#allocation14_spill] sm:$0xff]  ;;  %v7141_v33 = vld [vmem:[#allocation13_spill] sm:$0xff] }
  0x42   :  { %v7021_v37 = vsel %vm4797_vm8, 4294967295, %v7020_v37  ;;  %3647 = vmatprep.subr.msk.bf16.mxu0 %vm4797_vm8, %v6821_v31  ;;  %4031 = vmatprep.subr.msk.bf16.mxu1 %vm4797_vm8, %v6821_v31  ;;  %vm206_vm10 = vcmp.eq.s32.totalorder %v4714_v2, %v187_v24  ;;  %v236_v41 = vsel %vm204_vm9, 1.0, %v6829_v1  ;;  %v189_v42 = vadd.s32 1, %v4757_v25 }
  0x43   :  { %7022 = vst [vmem:[#allocation20_spill] sm:$0xff] %v7021_v37  ;;  %v4816_v43 = vmul.u32 2, %v94_v11  ;;  %v238_v44 = vsel %vm206_vm10, 1.0, %v6829_v1  ;;  %vm4819_vm11 = vmpackc.low %vm206_vm10, %vm204_vm9  ;;  %v4823_v46 = vsub.f32 %v236_v41, %v236_v41  ;;  %vm209_vm12 = vcmp.eq.s32.totalorder %v4719_v4, %v188_v40 }
  0x44   :  { %v7025_v45 = vsel %vm4819_vm11, 4294967295, %v7024_v45  ;;  %vm208_vm13 = vcmp.eq.s32.totalorder %v4714_v2, %v188_v40  ;;  %v4827_v47 = vsub.f32 %v238_v44, %v238_v44  ;;  %vm211_vm14 = vcmp.eq.s32.totalorder %v4719_v4, %v189_v42 }
  0x45   :  { %7023 = vst [vmem:[#allocation21_spill] sm:$0xff] %v4816_v43  ;;  %7026 = vst [vmem:[#allocation22_spill] sm:$0xff] %v7025_v45  ;;  %v241_v48 = vsel %vm209_vm12, 1.0, %v6829_v1  ;;  %vm210_vm15 = vcmp.eq.s32.totalorder %v4714_v2, %v189_v42  ;;  %3649 = vmatpush1.bf16.msk.msra.mxu0 %vm4819_vm11, %v6821_v31  ;;  %4033 = vmatpush1.bf16.msk.msra.mxu1 %vm4819_vm11, %v6821_v31  ;;  %v243_v49 = vsel %vm211_vm14, 1.0, %v6829_v1  ;;  %v240_v52 = vsel %vm208_vm13, 1.0, %v6829_v1 }
  0x46   :  { %vm4839_vm0 = vmpackc.low %vm211_vm14, %vm209_vm12  ;;  %v4843_v51 = vsub.f32 %v241_v48, %v241_v48  ;;  %v242_v53 = vsel %vm210_vm15, 1.0, %v6829_v1  ;;  %v4852_v54 = vsub.f32 %v243_v49, %v243_v49  ;;  %v4863_v56 = vsub.f32 %v240_v52, %v240_v52 }
  0x47   :  { %v7028_v50 = vsel %vm4839_vm0, 4294967295, %v7027_v50  ;;  %3651 = vmatprep.subr.msk.bf16.mxu0 %vm4839_vm0, %v6821_v31  ;;  %4035 = vmatprep.subr.msk.bf16.mxu1 %vm4839_vm0, %v6821_v31  ;;  %vm4859_vm1 = vmpackc.low %vm210_vm15, %vm208_vm13  ;;  %v4865_v57 = vsub.f32 %v242_v53, %v242_v53  ;;  %v4868_v58 = vmul.u32 2, %v4736_v15  ;;  %v190_v59 = vadd.s32 1, %v4816_v43 }
  0x48   :  { %7029 = vst [vmem:[#allocation23_spill] sm:$0xff] %v7028_v50  ;;  %v7031_v55 = vsel %vm4859_vm1, 4294967295, %v7030_v55  ;;  %v4872_v60 = vmul.u32 2, %v4743_v18  ;;  %v4875_v61 = vmul.u32 2, %v4746_v19  ;;  %v98_v62 = vadd.s32 80, %v4716_v3 }
  0x49   :  { %7032 = vst [vmem:[#allocation24_spill] sm:$0xff] %v7031_v55  ;;  %7033 = vst [vmem:[#allocation25_spill] sm:$0xff] %v4868_v58  ;;  %v191_v63 = vadd.s32 1, %v4868_v58  ;;  %v99_v0 = vadd.s32 88, %v4716_v3  ;;  %v100_v5 = vadd.s32 96, %v4716_v3  ;;  %v101_v7 = vadd.s32 104, %v4716_v3  ;;  %3653 = vmatpush1.bf16.msk.msra.mxu0 %vm4859_vm1, %v6821_v31  ;;  %4037 = vmatpush1.bf16.msk.msra.mxu1 %vm4859_vm1, %v6821_v31 }
  0x4a   :  { %7034 = vst [vmem:[#allocation26_spill] sm:$0xff] %v4872_v60  ;;  %7035 = vst [vmem:[#allocation27_spill] sm:$0xff] %v4875_v61  ;;  %vm213_vm2 = vcmp.eq.s32.totalorder %v4719_v4, %v190_v59  ;;  %vm212_vm3 = vcmp.eq.s32.totalorder %v4714_v2, %v190_v59  ;;  %v192_v8 = vadd.s32 1, %v4872_v60  ;;  %v193_v9 = vadd.s32 1, %v4875_v61 }
  0x4b   :  { %vm215_vm5 = vcmp.eq.s32.totalorder %v4719_v4, %v191_v63  ;;  %v245_v10 = vsel %vm213_vm2, 1.0, %v6829_v1  ;;  %vm214_vm6 = vcmp.eq.s32.totalorder %v4714_v2, %v191_v63  ;;  %v244_v11 = vsel %vm212_vm3, 1.0, %v6829_v1 }
  0x4c   :  { %v247_v13 = vsel %vm215_vm5, 1.0, %v6829_v1  ;;  %vm4899_vm9 = vmpackc.low %vm215_vm5, %vm213_vm2  ;;  %v7036_v15 = vmov 0  ;;  %v4903_v18 = vsub.f32 %v245_v10, %v245_v10  ;;  %v246_v19 = vsel %vm214_vm6, 1.0, %v6829_v1 }
  0x4d   :  { %v7037_v15 = vsel %vm4899_vm9, 4294967295, %v7036_v15  ;;  %v4906_v20 = vsub.f32 %v244_v11, %v244_v11  ;;  %3655 = vmatprep.subr.msk.bf16.mxu0 %vm4899_vm9, %v6821_v31  ;;  %v4911_v21 = vsub.f32 %v247_v13, %v247_v13  ;;  %4039 = vmatprep.subr.msk.bf16.mxu1 %vm4899_vm9, %v6821_v31  ;;  %vm4918_vm10 = vmpackc.low %vm214_vm6, %vm212_vm3  ;;  %v7039_v22 = vmov 0 }
  0x4e   :  { %7038 = vst [vmem:[#allocation28_spill] sm:$0xff] %v7037_v15  ;;  %v7040_v22 = vsel %vm4918_vm10, 4294967295, %v7039_v22  ;;  %v4922_v23 = vsub.f32 %v246_v19, %v246_v19  ;;  %vm217_vm12 = vcmp.eq.s32.totalorder %v4719_v4, %v192_v8  ;;  %v4925_v24 = vmul.u32 2, %v98_v62  ;;  %3657 = vmatpush1.bf16.msk.msra.mxu0 %vm4918_vm10, %v6821_v31  ;;  %4041 = vmatpush1.bf16.msk.msra.mxu1 %vm4918_vm10, %v6821_v31 }
  0x4f   :  { %7041 = vst [vmem:[#allocation29_spill] sm:$0xff] %v7040_v22  ;;  %vm219_vm13 = vcmp.eq.s32.totalorder %v4719_v4, %v193_v9  ;;  %v249_v28 = vsel %vm217_vm12, 1.0, %v6829_v1  ;;  %vm216_vm14 = vcmp.eq.s32.totalorder %v4714_v2, %v192_v8  ;;  %vm218_vm15 = vcmp.eq.s32.totalorder %v4714_v2, %v193_v9 }
  0x50   :  { %7042 = vst [vmem:[#allocation30_spill] sm:$0xff] %v4925_v24  ;;  %v251_v30 = vsel %vm219_vm13, 1.0, %v6829_v1  ;;  %vm4938_vm2 = vmpackc.low %vm219_vm13, %vm217_vm12  ;;  %v7043_v35 = vmov 0  ;;  %v4942_v36 = vsub.f32 %v249_v28, %v249_v28  ;;  %v248_v40 = vsel %vm216_vm14, 1.0, %v6829_v1 }
  0x51   :  { %v7044_v35 = vsel %vm4938_vm2, 4294967295, %v7043_v35  ;;  %v250_v41 = vsel %vm218_vm15, 1.0, %v6829_v1  ;;  %3659 = vmatprep.subr.msk.bf16.mxu0 %vm4938_vm2, %v6821_v31  ;;  %v4949_v42 = vsub.f32 %v251_v30, %v251_v30  ;;  %4043 = vmatprep.subr.msk.bf16.mxu1 %vm4938_vm2, %v6821_v31  ;;  %vm4954_vm3 = vmpackc.low %vm218_vm15, %vm216_vm14  ;;  %v7046_v44 = vmov 0 }
  0x52   :  { %7045 = vst [vmem:[#allocation31_spill] sm:$0xff] %v7044_v35  ;;  %v7047_v44 = vsel %vm4954_vm3, 4294967295, %v7046_v44  ;;  %v4958_v48 = vsub.f32 %v248_v40, %v248_v40  ;;  %v4960_v49 = vsub.f32 %v250_v41, %v250_v41  ;;  %v4962_v52 = vmul.u32 2, %v99_v0  ;;  %3661 = vmatpush1.bf16.msk.msra.mxu0 %vm4954_vm3, %v6821_v31  ;;  %4045 = vmatpush1.bf16.msk.msra.mxu1 %vm4954_vm3, %v6821_v31 }
  0x53   :  { %7048 = vst [vmem:[#allocation32_spill] sm:$0xff] %v7047_v44  ;;  %v194_v53 = vadd.s32 1, %v4925_v24  ;;  %v4965_v59 = vmul.u32 2, %v100_v5  ;;  %v4967_v62 = vmul.u32 2, %v101_v7  ;;  %v102_v63 = vadd.s32 112, %v4716_v3 }
  0x54   :  { %7049 = vst [vmem:[#allocation33_spill] sm:$0xff] %v4962_v52  ;;  %v195_v8 = vadd.s32 1, %v4962_v52  ;;  %v103_v0 = vadd.s32 120, %v4716_v3  ;;  %v7052_v19 = vmov 0  ;;  %v7067_v61 = vand.u32 4294901760, %v4760_v26 }
  0x55   :  { %7050 = vst [vmem:[#allocation34_spill] sm:$0xff] %v4965_v59  ;;  %7051 = vst [vmem:[#allocation35_spill] sm:$0xff] %v4967_v62  ;;  %vm221_vm5 = vcmp.eq.s32.totalorder %v4719_v4, %v194_v53  ;;  %vm220_vm6 = vcmp.eq.s32.totalorder %v4714_v2, %v194_v53  ;;  %v196_v7 = vadd.s32 1, %v4965_v59  ;;  %v197_v10 = vadd.s32 1, %v4967_v62  ;;  %v73_v62 = vld [vmem:[#allocation7] sm:$0xff] }
  0x56   :  { %vm223_vm12 = vcmp.eq.s32.totalorder %v4719_v4, %v195_v8  ;;  %v253_v11 = vsel %vm221_vm5, 1.0, %v6829_v1  ;;  %vm222_vm13 = vcmp.eq.s32.totalorder %v4714_v2, %v195_v8  ;;  %v252_v3 = vsel %vm220_vm6, 1.0, %v6829_v1 }
  0x57   :  { %v255_v13 = vsel %vm223_vm12, 1.0, %v6829_v1  ;;  %vm4991_vm14 = vmpackc.low %vm223_vm12, %vm221_vm5  ;;  %v4995_v28 = vsub.f32 %v253_v11, %v253_v11  ;;  %v254_v30 = vsel %vm222_vm13, 1.0, %v6829_v1  ;;  %v4998_v40 = vsub.f32 %v252_v3, %v252_v3 }
  0x58   :  { %v7053_v19 = vsel %vm4991_vm14, 4294967295, %v7052_v19  ;;  %3663 = vmatprep.subr.msk.bf16.mxu0 %vm4991_vm14, %v6821_v31  ;;  %v5003_v41 = vsub.f32 %v255_v13, %v255_v13  ;;  %4047 = vmatprep.subr.msk.bf16.mxu1 %vm4991_vm14, %v6821_v31  ;;  %vm5010_vm15 = vmpackc.low %vm222_vm13, %vm220_vm6  ;;  %v7055_v8 = vmov 0  ;;  %v5014_v11 = vsub.f32 %v254_v30, %v254_v30 }
  0x59   :  { %7054 = vst [vmem:[#allocation36_spill] sm:$0xff] %v7053_v19  ;;  %v7056_v8 = vsel %vm5010_vm15, 4294967295, %v7055_v8  ;;  %vm225_vm5 = vcmp.eq.s32.totalorder %v4719_v4, %v196_v7  ;;  %v5017_v3 = vmul.u32 2, %v102_v63  ;;  %3665 = vmatpush1.bf16.msk.msra.mxu0 %vm5010_vm15, %v6821_v31  ;;  %4049 = vmatpush1.bf16.msk.msra.mxu1 %vm5010_vm15, %v6821_v31  ;;  %vm227_vm12 = vcmp.eq.s32.totalorder %v4719_v4, %v197_v10  ;;  %v63_v63 = vld [vmem:[%s6812_s1] sm:$0xff] }
  0x5a   :  { %7057 = vst [vmem:[#allocation37_spill] sm:$0xff] %v7056_v8  ;;  %v257_v53 = vsel %vm225_vm5, 1.0, %v6829_v1  ;;  %vm224_vm6 = vcmp.eq.s32.totalorder %v4714_v2, %v196_v7  ;;  %vm226_vm13 = vcmp.eq.s32.totalorder %v4714_v2, %v197_v10  ;;  %v259_v13 = vsel %vm227_vm12, 1.0, %v6829_v1  ;;  %vm5033_vm14 = vmpackc.low %vm227_vm12, %vm225_vm5 }
  0x5b   :  { %7058 = vst [vmem:[#allocation38_spill] sm:$0xff] %v5017_v3  ;;  %v7059_v30 = vmov 0  ;;  %v5037_v5 = vsub.f32 %v257_v53, %v257_v53  ;;  %v256_v9 = vsel %vm224_vm6, 1.0, %v6829_v1  ;;  %v258_v31 = vsel %vm226_vm13, 1.0, %v6829_v1  ;;  %vm5049_vm5 = vmpackc.low %vm226_vm13, %vm224_vm6 }
  0x5c   :  { %v7060_v30 = vsel %vm5033_vm14, 4294967295, %v7059_v30  ;;  %v7062_v7 = vmov 1.0|1.0   ;;  %v5044_v10 = vsub.f32 %v259_v13, %v259_v13  ;;  %v7063_v59 = vmov 0 }
  0x5d   :  { %7061 = vst [vmem:[#allocation39_spill] sm:$0xff] %v7060_v30  ;;  %3667 = vmatprep.subr.msk.bf16.mxu0 %vm5033_vm14, %v7062_v7  ;;  %4051 = vmatprep.subr.msk.bf16.mxu1 %vm5033_vm14, %v7062_v7  ;;  %v7064_v59 = vsel %vm5049_vm5, 4294967295, %v7063_v59  ;;  %v5053_v53 = vsub.f32 %v256_v9, %v256_v9  ;;  %v5055_v52 = vsub.f32 %v258_v31, %v258_v31  ;;  %v5057_v1 = vmul.u32 2, %v103_v0 }
  0x5e   :  { %7065 = vst [vmem:[#allocation40_spill] sm:$0xff] %v7064_v59  ;;  %v198_v24 = vadd.s32 1, %v5017_v3  ;;  %v342_v13 = vsub.f32 %v4760_v26, %v7067_v61  ;;  %v7068_v60 = vand.u32 4294901760, %v4776_v32  ;;  %v64_v43 = vmax.f32 %v63_v63, 0.0  ;;  %3669 = vmatpush1.bf16.msk.msra.mxu0 %vm5049_vm5, %v7062_v7  ;;  %4053 = vmatpush1.bf16.msk.msra.mxu1 %vm5049_vm5, %v7062_v7 }
  0x5f   :  { %7066 = vst [vmem:[#allocation41_spill] sm:$0xff] %v5057_v1  ;;  %v199_v31 = vadd.s32 1, %v5057_v1  ;;  %v77_v61 = vmax.f32 %v73_v62, 0.0  ;;  %v7069_v3 = vmov 0.0   ;;  %v7073_v17 = vmov 0 }
  0x60   :  { %v352_v58 = vsub.f32 %v4776_v32, %v7068_v60  ;;  %vm229_vm12 = vcmp.eq.s32.totalorder %v4719_v4, %v198_v24  ;;  %vm228_vm6 = vcmp.eq.s32.totalorder %v4714_v2, %v198_v24  ;;  %v343_v60 = vand.u32 4294901760, %v342_v13  ;;  %83 = vst [vmem:[#allocation8 + $0x8] sm:$0xff] %v64_v43 }
  0x61   :  { %vm231_vm13 = vcmp.eq.s32.totalorder %v4719_v4, %v199_v31  ;;  %v261_v25 = vsel %vm229_vm12, 1.0, %v7069_v3  ;;  %vm230_vm5 = vcmp.eq.s32.totalorder %v4714_v2, %v199_v31  ;;  %v260_v0 = vsel %vm228_vm6, 1.0, %v7069_v3  ;;  %1596 = vst [vmem:[%s6817_s6 + $0x8] sm:$0xff] %v77_v61 }
  0x62   :  { %v353_v63 = vand.u32 4294901760, %v352_v58  ;;  %v263_v62 = vsel %vm231_vm13, 1.0, %v7069_v3  ;;  %vm5087_vm14 = vmpackc.low %vm231_vm13, %vm229_vm12  ;;  %v7070_v13 = vmov 0  ;;  %v5091_v58 = vsub.f32 %v261_v25, %v261_v25 }
  0x63   :  { %v7071_v13 = vsel %vm5087_vm14, 4294967295, %v7070_v13  ;;  %v262_v9 = vsel %vm230_vm5, 1.0, %v7069_v3  ;;  %v5094_v1 = vsub.f32 %v260_v0, %v260_v0  ;;  %3671 = vmatprep.subr.msk.bf16.mxu0 %vm5087_vm14, %v7062_v7  ;;  %v5099_v31 = vsub.f32 %v263_v62, %v263_v62  ;;  %4055 = vmatprep.subr.msk.bf16.mxu1 %vm5087_vm14, %v7062_v7  ;;  %vm5106_vm12 = vmpackc.low %vm230_vm5, %vm228_vm6 }
  0x64   :  { %7072 = vst [vmem:[#allocation42_spill] sm:$0xff] %v7071_v13  ;;  %v7074_v17 = vsel %vm5106_vm12, 4294967295, %v7073_v17  ;;  %v5110_v25 = vsub.f32 %v262_v9, %v262_v9  ;;  %v3674_v0 = vpack.c.bf16 %v353_v63, %v343_v60  ;;  %v5112_v16 = vand.u32 4294901760, %v64_v43  ;;  %3673 = vmatpush1.bf16.msk.msra.mxu0 %vm5106_vm12, %v7062_v7  ;;  %4057 = vmatpush1.bf16.msk.msra.mxu1 %vm5106_vm12, %v7062_v7 }
  0x65   :  { %7075 = vst [vmem:[#allocation43_spill] sm:$0xff] %v7074_v17  ;;  %v7076_v62 = vand.u32 4294901760, %v4763_v27  ;;  %v7077_v14 = vand.u32 4294901760, %v4787_v34  ;;  %v5126_v2 = vand.u32 4294901760, %v77_v61  ;;  %v6873_v60 = vand.u32 4294901760, %v4801_v38 }
  0x66   :  { %3675 = vmatprep.subr.bf16.mxu0 %v3674_v0  ;;  %4059 = vmatprep.subr.bf16.mxu1 %v3674_v0  ;;  %v5130_v63 = vsub.f32 %v64_v43, %v5112_v16  ;;  %v6878_v12 = vand.u32 4294901760, %v4803_v39  ;;  %v6881_v4 = vand.u32 4294901760, %v4823_v46  ;;  %v6882_v6 = vand.u32 4294901760, %v4827_v47 }
  0x67   :  { %v347_v24 = vsub.f32 %v4763_v27, %v7076_v62  ;;  %v357_v9 = vsub.f32 %v4787_v34, %v7077_v14  ;;  %v5136_v13 = vsub.f32 %v77_v61, %v5126_v2  ;;  %v362_v14 = vsub.f32 %v4801_v38, %v6873_v60 }
  0x68   :  { %v6887_v0 = vand.u32 4294901760, %v5130_v63  ;;  %v372_v43 = vsub.f32 %v4803_v39, %v6878_v12  ;;  %v367_v59 = vsub.f32 %v4823_v46, %v6881_v4  ;;  %v6889_v60 = vand.u32 4294901760, %v4843_v51 }
  0x69   :  { %v348_v62 = vand.u32 4294901760, %v347_v24  ;;  %v358_v17 = vand.u32 4294901760, %v357_v9  ;;  %v377_v24 = vsub.f32 %v4827_v47, %v6882_v6  ;;  %v6888_v9 = vand.u32 4294901760, %v5136_v13 }
  0x6a   :  { %v363_v30 = vand.u32 4294901760, %v362_v14  ;;  %v332_v8 = vsub.f32 %v5130_v63, %v6887_v0  ;;  %v373_v19 = vand.u32 4294901760, %v372_v43  ;;  %v368_v12 = vand.u32 4294901760, %v367_v59 }
  0x6b   :  { %v3676_v61 = vpack.c.bf16 %v358_v17, %v348_v62  ;;  %v378_v44 = vand.u32 4294901760, %v377_v24  ;;  %v1668_v4 = vsub.f32 %v5136_v13, %v6888_v9  ;;  %v382_v17 = vsub.f32 %v4843_v51, %v6889_v60 }
  0x6c   :  { %v6894_v62 = vand.u32 4294901760, %v4852_v54  ;;  %v6891_v14 = vand.u32 4294901760, %v4863_v56  ;;  %v333_v6 = vand.u32 4294901760, %v332_v8  ;;  %v3678_v35 = vpack.c.bf16 %v373_v19, %v363_v30 }
  0x6d   :  { %v3680_v22 = vpack.c.bf16 %v378_v44, %v368_v12  ;;  %v6890_v0 = vand.u32 4294901760, %v4865_v57  ;;  %v1669_v43 = vand.u32 4294901760, %v1668_v4  ;;  %v383_v59 = vand.u32 4294901760, %v382_v17 }
  0x6e   :  { %v392_v24 = vsub.f32 %v4852_v54, %v6894_v62  ;;  %v387_v9 = vsub.f32 %v4863_v56, %v6891_v14  ;;  %334 = vmatmul.mubr.f32.vlgmr.msra.gmra.mrb[0].mxu0 %v333_v6  ;;  %v6892_v19 = vand.u32 4294901760, %v4903_v18  ;;  %v6893_v12 = vand.u32 4294901760, %v4911_v21 }
  0x6f   :  { %v397_v60 = vsub.f32 %v4865_v57, %v6890_v0  ;;  %v6899_v4 = vand.u32 4294901760, %v4906_v20  ;;  %3677 = vmatpush1.bf16.msra.mxu0 %v3676_v61  ;;  %1670 = vmatmul.mubr.f32.vlgmr.msra.gmra.mrb[0].mxu1 %v1669_v43  ;;  %v6897_v30 = vand.u32 4294901760, %v4922_v23  ;;  %v6898_v17 = vand.u32 4294901760, %v4942_v36 }
  0x70   :  { %v393_v44 = vand.u32 4294901760, %v392_v24  ;;  %v388_v8 = vand.u32 4294901760, %v387_v9  ;;  %4061 = vmatpush1.bf16.msra.mxu1 %v3676_v61  ;;  %3679 = vmatprep.subr.bf16.mxu0 %v3678_v35  ;;  %v402_v0 = vsub.f32 %v4903_v18, %v6892_v19  ;;  %v412_v14 = vsub.f32 %v4911_v21, %v6893_v12 }
  0x71   :  { %v398_v6 = vand.u32 4294901760, %v397_v60  ;;  %v407_v43 = vsub.f32 %v4906_v20, %v6899_v4  ;;  %4063 = vmatprep.subr.bf16.mxu1 %v3678_v35  ;;  %v417_v61 = vsub.f32 %v4922_v23, %v6897_v30  ;;  %v422_v60 = vsub.f32 %v4942_v36, %v6898_v17  ;;  %1675 = vmatprep.mubr.f32.mxu1 %v7069_v3 }
  0x72   :  { %v3682_v9 = vpack.c.bf16 %v393_v44, %v383_v59  ;;  %v6902_v24 = vand.u32 4294901760, %v4949_v42  ;;  %v403_v12 = vand.u32 4294901760, %v402_v0  ;;  %v413_v62 = vand.u32 4294901760, %v412_v14  ;;  %532 = vmatprep.mubr.f32.mxu0 %v7069_v3 }
  0x73   :  { %v3684_v19 = vpack.c.bf16 %v398_v6, %v388_v8  ;;  %v408_v15 = vand.u32 4294901760, %v407_v43  ;;  %3681 = vmatpush1.bf16.msra.mxu0 %v3680_v22  ;;  %v418_v35 = vand.u32 4294901760, %v417_v61  ;;  %v423_v59 = vand.u32 4294901760, %v422_v60  ;;  %v74_v8 = vld [vmem:[#allocation7 + $0x8] sm:$0xff] }
  0x74   :  { %v432_v44 = vsub.f32 %v4949_v42, %v6902_v24  ;;  %v6900_v30 = vand.u32 4294901760, %v4958_v48  ;;  %4065 = vmatpush1.bf16.msra.mxu1 %v3680_v22  ;;  %3683 = vmatprep.subr.bf16.mxu0 %v3682_v9  ;;  %v3686_v17 = vpack.c.bf16 %v413_v62, %v403_v12  ;;  %v6901_v4 = vand.u32 4294901760, %v4960_v49 }
  0x75   :  { %v6905_v0 = vand.u32 4294901760, %v4995_v28  ;;  %v6906_v14 = vand.u32 4294901760, %v5003_v41  ;;  %4067 = vmatprep.subr.bf16.mxu1 %v3682_v9  ;;  %v3688_v6 = vpack.c.bf16 %v418_v35, %v408_v15  ;;  %v6908_v60 = vand.u32 4294901760, %v4998_v40 }
  0x76   :  { %v433_v43 = vand.u32 4294901760, %v432_v44  ;;  %v427_v61 = vsub.f32 %v4958_v48, %v6900_v30  ;;  %v437_v22 = vsub.f32 %v4960_v49, %v6901_v4  ;;  %v6907_v15 = vand.u32 4294901760, %v5014_v11 }
  0x77   :  { %v442_v62 = vsub.f32 %v4995_v28, %v6905_v0  ;;  %v452_v12 = vsub.f32 %v5003_v41, %v6906_v14  ;;  %3685 = vmatpush1.bf16.msra.mxu0 %v3684_v19  ;;  %v447_v44 = vsub.f32 %v4998_v40, %v6908_v60  ;;  %v78_v30 = vmax.f32 %v74_v8, 0.0  ;;  %v75_v8 = vld [vmem:[#allocation7 + $0x10] sm:$0xff] }
  0x78   :  { %v3690_v9 = vpack.c.bf16 %v433_v43, %v423_v59  ;;  %v428_v35 = vand.u32 4294901760, %v427_v61  ;;  %4069 = vmatpush1.bf16.msra.mxu1 %v3684_v19  ;;  %3687 = vmatprep.subr.bf16.mxu0 %v3686_v17  ;;  %v438_v4 = vand.u32 4294901760, %v437_v22  ;;  %v457_v0 = vsub.f32 %v5014_v11, %v6907_v15 }
  0x79   :  { %v443_v24 = vand.u32 4294901760, %v442_v62  ;;  %v453_v55 = vand.u32 4294901760, %v452_v12  ;;  %4071 = vmatprep.subr.bf16.mxu1 %v3686_v17  ;;  %v448_v14 = vand.u32 4294901760, %v447_v44  ;;  %1597 = vst [vmem:[%s6817_s6 + $0x18] sm:$0xff] %v78_v30  ;;  %v5227_v59 = vand.u32 4294901760, %v78_v30 }
  0x7a   :  { %v6909_v43 = vand.u32 4294901760, %v5037_v5  ;;  %v6910_v19 = vand.u32 4294901760, %v5044_v10  ;;  %v3692_v61 = vpack.c.bf16 %v438_v4, %v428_v35  ;;  %v458_v62 = vand.u32 4294901760, %v457_v0 }
  0x7b   :  { %v3694_v22 = vpack.c.bf16 %v453_v55, %v443_v24  ;;  %v6914_v12 = vand.u32 4294901760, %v5053_v53  ;;  %3689 = vmatpush1.bf16.msra.mxu0 %v3688_v6  ;;  %v5233_v17 = vsub.f32 %v78_v30, %v5227_v59  ;;  %v6913_v60 = vand.u32 4294901760, %v5055_v52 }
  0x7c   :  { %v462_v44 = vsub.f32 %v5037_v5, %v6909_v43  ;;  %v472_v15 = vsub.f32 %v5044_v10, %v6910_v19  ;;  %4073 = vmatpush1.bf16.msra.mxu1 %v3688_v6  ;;  %3691 = vmatprep.subr.bf16.mxu0 %v3690_v9  ;;  %v3696_v55 = vpack.c.bf16 %v458_v62, %v448_v14  ;;  %v79_v24 = vmax.f32 %v75_v8, 0.0  ;;  %v76_v8 = vld [vmem:[#allocation7 + $0x18] sm:$0xff] }
  0x7d   :  { %v467_v4 = vsub.f32 %v5053_v53, %v6914_v12  ;;  %v6915_v30 = vand.u32 4294901760, %v5091_v58  ;;  %4075 = vmatprep.subr.bf16.mxu1 %v3690_v9  ;;  %v6920_v0 = vand.u32 4294901760, %v5233_v17  ;;  %v477_v19 = vsub.f32 %v5055_v52, %v6913_v60 }
  0x7e   :  { %v463_v35 = vand.u32 4294901760, %v462_v44  ;;  %v473_v43 = vand.u32 4294901760, %v472_v15  ;;  %1598 = vst [vmem:[%s6817_s6 + $0x28] sm:$0xff] %v79_v24  ;;  %v5253_v14 = vand.u32 4294901760, %v79_v24  ;;  %v6921_v9 = vand.u32 4294901760, %v5099_v31 }
  0x7f   :  { %v468_v50 = vand.u32 4294901760, %v467_v4  ;;  %v482_v6 = vsub.f32 %v5091_v58, %v6915_v30  ;;  %3693 = vmatpush1.bf16.msra.mxu0 %v3692_v61  ;;  %v1679_v15 = vsub.f32 %v5233_v17, %v6920_v0  ;;  %v478_v44 = vand.u32 4294901760, %v477_v19 }
  0x80   :  { %v3698_v62 = vpack.c.bf16 %v473_v43, %v463_v35  ;;  %v486_v4 = vand.u32 4294901760, %v5094_v1  ;;  %4077 = vmatpush1.bf16.msra.mxu1 %v3692_v61  ;;  %3695 = vmatprep.subr.bf16.mxu0 %v3694_v22  ;;  %v5264_v60 = vsub.f32 %v79_v24, %v5253_v14  ;;  %v492_v30 = vsub.f32 %v5099_v31, %v6921_v9 }
  0x81   :  { %v483_v12 = vand.u32 4294901760, %v482_v6  ;;  %v496_v45 = vand.u32 4294901760, %v5110_v25  ;;  %4079 = vmatprep.subr.bf16.mxu1 %v3694_v22  ;;  %v1680_v37 = vand.u32 4294901760, %v1679_v15  ;;  %v80_v43 = vmax.f32 %v76_v8, 0.0 }
  0x82   :  { %v487_v0 = vsub.f32 %v5094_v1, %v486_v4  ;;  %v6923_v19 = vand.u32 4294901760, %v5264_v60  ;;  %v493_v35 = vand.u32 4294901760, %v492_v30  ;;  %v3700_v24 = vpack.c.bf16 %v478_v44, %v468_v50 }
  0x83   :  { %v497_v61 = vsub.f32 %v5110_v25, %v496_v45  ;;  %3697 = vmatpush1.bf16.msra.mxu0 %v3696_v55  ;;  %1681 = vmatmul.mubr.f32.gmra.mrb[2].mxu1 %v1680_v37  ;;  %1599 = vst [vmem:[%s6817_s6 + $0x38] sm:$0xff] %v80_v43  ;;  %v5276_v9 = vand.u32 4294901760, %v80_v43  ;;  %v3710_v44 = vpack.c.bf16 %v4803_v39, %v4801_v38 }
  0x84   :  { %v488_v6 = vand.u32 4294901760, %v487_v0  ;;  %4081 = vmatpush1.bf16.msra.mxu1 %v3696_v55  ;;  %3699 = vmatprep.subr.bf16.mxu0 %v3698_v62  ;;  %v1690_v22 = vsub.f32 %v5264_v60, %v6923_v19  ;;  %v3702_v8 = vpack.c.bf16 %v493_v35, %v483_v12  ;;  %v3706_v55 = vpack.c.bf16 %v4776_v32, %v4760_v26 }
  0x85   :  { %v498_v30 = vand.u32 4294901760, %v497_v61  ;;  %1686 = vmatprep.mubr.f32.mxu1 %v7069_v3  ;;  %4083 = vmatprep.subr.bf16.mxu1 %v3698_v62  ;;  %v5283_v37 = vsub.f32 %v80_v43, %v5276_v9  ;;  %v3708_v62 = vpack.c.bf16 %v4787_v34, %v4763_v27  ;;  %v7078_v43 = vand.u32 4294901760, %v4760_v26 }
  0x86   :  { %v1691_v50 = vand.u32 4294901760, %v1690_v22  ;;  %v7079_v35 = vand.u32 4294901760, %v4776_v32  ;;  %v7085_v26 = vand.u32 4294901760, %v4827_v47 }
  0x87   :  { %3701 = vmatpush1.bf16.msra.mxu0 %v3700_v24  ;;  %v3704_v0 = vpack.c.bf16 %v498_v30, %v488_v6  ;;  %v6922_v15 = vand.u32 4294901760, %v5283_v37  ;;  %v7081_v6 = vand.u32 4294901760, %v4787_v34  ;;  %v7082_v30 = vand.u32 4294901760, %v4801_v38 }
  0x88   :  { %1692 = vmatmul.mubr.f32.gmra.mrb[4].mxu1 %v1691_v50  ;;  %3703 = vmatprep.subr.bf16.mxu0 %v3702_v8  ;;  %v5300_v61 = vpack.c.bf16 %v7079_v35, %v7078_v43  ;;  %v7083_v50 = vand.u32 4294901760, %v4803_v39  ;;  %v7087_v34 = vand.u32 4294901760, %v4852_v54  ;;  %v7088_v38 = vand.u32 4294901760, %v4863_v56 }
  0x89   :  { %4085 = vmatpush1.bf16.msra.mxu1 %v3700_v24  ;;  %1697 = vmatprep.mubr.f32.mxu1 %v7069_v3  ;;  %v1701_v12 = vsub.f32 %v5283_v37, %v6922_v15  ;;  %v7080_v24 = vand.u32 4294901760, %v4763_v27  ;;  %v7086_v27 = vand.u32 4294901760, %v4843_v51  ;;  %v7089_v39 = vand.u32 4294901760, %v4865_v57 }
  0x8a   :  { %4087 = vmatprep.subr.bf16.mxu1 %v3702_v8  ;;  %v5312_v15 = vpack.c.bf16 %v7083_v50, %v7082_v30  ;;  %v7084_v8 = vand.u32 4294901760, %v4823_v46  ;;  %v7095_v50 = vand.u32 4294901760, %v4922_v23 }
  0x8b   :  { %v5306_v22 = vpack.c.bf16 %v7081_v6, %v7080_v24  ;;  %3705 = vmatpush1.bf16.msra.mxu0 %v3704_v0  ;;  %v1702_v32 = vand.u32 4294901760, %v1701_v12  ;;  %v5324_v43 = vpack.c.bf16 %v7087_v34, %v7086_v27  ;;  %v5330_v35 = vpack.c.bf16 %v7089_v39, %v7088_v38 }
  0x8c   :  { %v5318_v19 = vpack.c.bf16 %v7085_v26, %v7084_v8  ;;  %v7091_v24 = vand.u32 4294901760, %v4903_v18  ;;  %v7092_v6 = vand.u32 4294901760, %v4911_v21  ;;  %3707 = vmatprep.subr.bf16.mxu0 %v3706_v55  ;;  %v7094_v12 = vand.u32 4294901760, %v4906_v20 }
  0x8d   :  { %7090 = vst [vmem:[#allocation44_spill] sm:$0xff] %v5330_v35  ;;  %v7097_v26 = vand.u32 4294901760, %v4942_v36  ;;  %v7098_v27 = vand.u32 4294901760, %v4949_v42  ;;  %v7100_v38 = vand.u32 4294901760, %v4958_v48  ;;  %v7101_v39 = vand.u32 4294901760, %v4960_v49  ;;  %1703 = vmatmul.mubr.f32.gmra.mrb[6].mxu1 %v1702_v32 }
  0x8e   :  { %v5336_v30 = vpack.c.bf16 %v7092_v6, %v7091_v24  ;;  %v5342_v8 = vpack.c.bf16 %v7095_v50, %v7094_v12  ;;  %v7103_v24 = vand.u32 4294901760, %v4995_v28  ;;  %v7104_v6 = vand.u32 4294901760, %v5003_v41  ;;  %4089 = vmatpush1.bf16.msra.mxu1 %v3704_v0  ;;  %1901 = vmatprep.mubr.f32.mxu1 %v7069_v3  ;;  %v7124_v0 = vld [vmem:[#allocation39_spill] sm:$0xff] }
  0x8f   :  { %v5348_v34 = vpack.c.bf16 %v7098_v27, %v7097_v26  ;;  %v5354_v35 = vpack.c.bf16 %v7101_v39, %v7100_v38  ;;  %v7105_v12 = vand.u32 4294901760, %v4998_v40  ;;  %v7106_v50 = vand.u32 4294901760, %v5014_v11  ;;  %4091 = vmatprep.subr.bf16.mxu1 %v3706_v55  ;;  %534 = vmatmul.mubr.f32.vlgmr.msra.gmra.mrb[0].mxu0 %v5112_v16 }
  0x90   :  { %7093 = vst [vmem:[#allocation45_spill] sm:$0xff] %v5336_v30  ;;  %7096 = vst [vmem:[#allocation46_spill] sm:$0xff] %v5342_v8  ;;  %v5360_v30 = vpack.c.bf16 %v7104_v6, %v7103_v24  ;;  %v7107_v26 = vand.u32 4294901760, %v5037_v5  ;;  %v7108_v27 = vand.u32 4294901760, %v5044_v10  ;;  %v7109_v38 = vand.u32 4294901760, %v5053_v53  ;;  %3709 = vmatpush1.bf16.msra.mxu0 %v3708_v62  ;;  %636 = vmatprep.mubr.f32.mxu0 %v7069_v3 }
  0x91   :  { %7099 = vst [vmem:[#allocation47_spill] sm:$0xff] %v5348_v34  ;;  %7102 = vst [vmem:[#allocation48_spill] sm:$0xff] %v5354_v35  ;;  %v5366_v8 = vpack.c.bf16 %v7106_v50, %v7105_v12  ;;  %v7110_v39 = vand.u32 4294901760, %v5055_v52  ;;  %v7111_v32 = vand.u32 4294901760, %v5091_v58  ;;  %v7112_v24 = vand.u32 4294901760, %v5099_v31  ;;  %1903 = vmatmul.mubr.f32.vlgmr.msra.gmra.mrb[0].mxu1 %v5126_v2  ;;  %3711 = vmatprep.subr.bf16.mxu0 %v3710_v44 }
  0x92   :  { %v5372_v34 = vpack.c.bf16 %v7108_v27, %v7107_v26  ;;  %v5387_v12 = vpack.c.bf16 %v496_v45, %v486_v4  ;;  %v3712_v50 = vpack.c.bf16 %v4827_v47, %v4823_v46  ;;  %v3714_v26 = vpack.c.bf16 %v4852_v54, %v4843_v51  ;;  %4093 = vmatpush1.bf16.msra.mxu1 %v3708_v62  ;;  %v7126_v62 = vld [vmem:[#allocation40_spill] sm:$0xff]  ;;  %v68_v27 = vld [vmem:[#allocation5 + $0x18] sm:$0xff] }
  0x93   :  { %v5378_v35 = vpack.c.bf16 %v7110_v39, %v7109_v38  ;;  %v5384_v6 = vpack.c.bf16 %v7112_v24, %v7111_v32  ;;  %1908 = vmatprep.mubr.f32.mxu1 %v7069_v3  ;;  %4095 = vmatprep.subr.bf16.mxu1 %v3710_v44  ;;  %v3716_v45 = vpack.c.bf16 %v4865_v57, %v4863_v56  ;;  %v5549_v39 = vmax.f32 %v68_v27, 0.0 }
  0x94   :  { %3713 = vmatpush1.bf16.msra.mxu0 %v3712_v50  ;;  %v3718_v46 = vpack.c.bf16 %v4911_v21, %v4903_v18  ;;  %v3720_v47 = vpack.c.bf16 %v4922_v23, %v4906_v20  ;;  %v3722_v51 = vpack.c.bf16 %v4949_v42, %v4942_v36  ;;  %v3724_v54 = vpack.c.bf16 %v4960_v49, %v4958_v48  ;;  %v61_v23 = vld [vmem:[#allocation2] sm:$0xff]  ;;  %v65_v36 = vld [vmem:[#allocation5] sm:$0xff] }
  0x95   :  { %3715 = vmatprep.subr.bf16.mxu0 %v3714_v26  ;;  %1910 = vmatmul.mubr.f32.gmra.mrb[2].mxu1 %v5227_v59  ;;  %v3726_v56 = vpack.c.bf16 %v5003_v41, %v4995_v28  ;;  %v3728_v57 = vpack.c.bf16 %v5014_v11, %v4998_v40  ;;  %v3730_v18 = vpack.c.bf16 %v5044_v10, %v5037_v5  ;;  %v5423_v42 = vmax.f32 %v61_v23, 0.0  ;;  %v66_v10 = vld [vmem:[#allocation5 + $0x8] sm:$0xff]  ;;  %v7154_v41 = vld [vmem:[#allocation21_spill] sm:$0xff] }
  0x96   :  { %4097 = vmatpush1.bf16.msra.mxu1 %v3712_v50  ;;  %1915 = vmatprep.mubr.f32.mxu1 %v7069_v3  ;;  %v3732_v20 = vpack.c.bf16 %v5055_v52, %v5053_v53  ;;  %v3734_v21 = vpack.c.bf16 %v5099_v31, %v5091_v58  ;;  %v5425_v48 = vmax.f32 %v65_v36, 0.0  ;;  %v3736_v49 = vpack.c.bf16 %v5110_v25, %v5094_v1  ;;  %v7121_v58 = vld [vmem:[#allocation36_spill] sm:$0xff]  ;;  %v7150_v36 = vld [vmem:[#allocation19_spill] sm:$0xff]  ;;  %v7158_v53 = vld [vmem:[#allocation25_spill] sm:$0xff] }
  0x97   :  { %4099 = vmatprep.subr.bf16.mxu1 %v3714_v26  ;;  %81 = vst [vmem:[#allocation8] sm:$0xff] %v5423_v42  ;;  %vm7122_vm5 = vnez %v7121_v58  ;;  %v5504_v31 = vmax.f32 %v66_v10, 0.0  ;;  %v67_v25 = vld [vmem:[#allocation5 + $0x10] sm:$0xff]  ;;  %vm7125_vm6 = vnez %v7124_v0  ;;  %vm7127_vm13 = vnez %v7126_v62  ;;  %1595 = vst [vmem:[%s6817_s6 + $0x30] sm:$0xff] %v5549_v39  ;;  %v7159_v0 = vld [vmem:[#allocation26_spill] sm:$0xff] }
  0x98   :  { %3717 = vmatpush1.bf16.msra.mxu0 %v3716_v45  ;;  %1592 = vst [vmem:[%s6817_s6] sm:$0xff] %v5425_v48  ;;  %v5522_v55 = vmax.f32 %v67_v25, 0.0  ;;  %v7130_v32 = vand.u32 4294901760, %v5130_v63  ;;  %v7131_v24 = vand.u32 4294901760, %v5136_v13  ;;  %v7151_v5 = vmov 0  ;;  %v7160_v62 = vld [vmem:[#allocation27_spill] sm:$0xff] }
  0x99   :  { %3719 = vmatprep.subr.bf16.mxu0 %v3718_v46  ;;  %1917 = vmatmul.mubr.f32.gmra.mrb[4].mxu1 %v5253_v14  ;;  %1593 = vst [vmem:[%s6817_s6 + $0x10] sm:$0xff] %v5504_v31  ;;  %v7155_v11 = vmov 0  ;;  %v7161_v27 = vmov 0 }
  0x9a   :  { %4101 = vmatpush1.bf16.msra.mxu1 %v3716_v45  ;;  %1922 = vmatprep.mubr.f32.mxu1 %v7069_v3  ;;  %1594 = vst [vmem:[%s6817_s6 + $0x20] sm:$0xff] %v5522_v55  ;;  %s4629_s6 = smov [#allocation8]  }
  0x9b   :  { %4103 = vmatprep.subr.bf16.mxu1 %v3718_v46  ;;  %s3233_s8 = sshll.u32 %s4629_s6, 4  ;;  %s3234_s8 = int_to_ptr.vmem [resolvable:$true] %s3233_s8 }
  0x9c   :  { %3721 = vmatpush1.bf16.msra.mxu0 %v3720_v47  ;;  %s4594_s9 = scalar_lea.vmem %s3234_s8, 256  ;;  %p4599_p11 = scmp.lt.s32.totalorder %s3234_s8, %s3234_s8 }
  0x9d   :  { %3723 = vmatprep.subr.bf16.mxu0 %v3722_v51  ;;  %1924 = vmatmul.mubr.f32.gmra.mrb[6].mxu1 %v5276_v9  ;;  %p4595_p10 = scmp.ne.s32.totalorder %s3234_s8, %s4594_s9  ;;  %p4600_p12 = scmp.lt.s32.totalorder %s4594_s9, %s4594_s9 }
  0x9e   :  { %4105 = vmatpush1.bf16.msra.mxu1 %v3720_v47  ;;  %2026 = vmatprep.mubr.f32.mxu1 %v7069_v3  ;;  %v7146_v47 = vld [vmem:[#allocation18_spill] sm:$0xff] }
  0x9f   :  { %4107 = vmatprep.subr.bf16.mxu1 %v3722_v51  ;;  %v7147_v51 = vmov 0  ;;  %p4601_p13 = por %p4600_p12, %p4599_p11 }
  0xa0   :  { %3725 = vmatpush1.bf16.msra.mxu0 %v3724_v54 }
  0xa1   :  { %3727 = vmatprep.subr.bf16.mxu0 %v3726_v56  ;;  %p4602_p0 = pnand %p4601_p13, %p4595_p10 }
  0xa2   :  { %4109 = vmatpush1.bf16.msra.mxu1 %v3724_v54 }
  0xa3   :  { %4111 = vmatprep.subr.bf16.mxu1 %v3726_v56 }
  0xa4   :  { %3729 = vmatpush1.bf16.msra.mxu0 %v3728_v57 }
  0xa5   :  { %3731 = vmatprep.subr.bf16.mxu0 %v3730_v18 }
  0xa6   :  { %4113 = vmatpush1.bf16.msra.mxu1 %v3728_v57 }
  0xa7   :  { %4115 = vmatprep.subr.bf16.mxu1 %v3730_v18 }
  0xa8   :  { %3733 = vmatpush1.bf16.msra.mxu0 %v3732_v20 }
  0xa9   :  { %3735 = vmatprep.subr.bf16.mxu0 %v3734_v21 }
  0xaa   :  { %4117 = vmatpush1.bf16.msra.mxu1 %v3732_v20 }
  0xab   :  { %4119 = vmatprep.subr.bf16.mxu1 %v3734_v21 }
  0xac   :  { %3737 = vmatpush1.bf16.msra.mxu0 %v3736_v49 }
  0xad   :  { %3739 = vmatprep.subr.msk.bf16.mxu0 %vm4766_vm4, %v7062_v7 }
  0xae   :  { %4121 = vmatpush1.bf16.msra.mxu1 %v3736_v49 }
  0xaf   :  { %4123 = vmatprep.subr.msk.bf16.mxu1 %vm4766_vm4, %v7062_v7  ;;  %639 = vmatmul.mubr.f32.vlgmr.msra.gmra.mrb[0].mxu0 %v5130_v63  ;;  %v7132_v63 = vand.u32 4294901760, %v5233_v17 }
  0xb0   :  { %3741 = vmatpush1.bf16.msk.msra.mxu0 %vm4783_vm7, %v7062_v7  ;;  %709 = vmatprep.mubr.f32.mxu0 %v7069_v3 }
  0xb1   :  { %2029 = vmatmul.mubr.f32.vlgmr.msra.gmra.mrb[0].mxu1 %v5136_v13  ;;  %3743 = vmatprep.subr.msk.bf16.mxu0 %vm4797_vm8, %v7062_v7  ;;  %v7133_v13 = vld [vmem:[#allocation44_spill] sm:$0xff] }
  0xb2   :  { %4125 = vmatpush1.bf16.msk.msra.mxu1 %vm4783_vm7, %v7062_v7  ;;  %2034 = vmatprep.mubr.f32.mxu1 %v7069_v3 }
  0xb3   :  { %4127 = vmatprep.subr.msk.bf16.mxu1 %vm4797_vm8, %v7062_v7 }
  0xb4   :  { %3745 = vmatpush1.bf16.msk.msra.mxu0 %vm4819_vm11, %v7062_v7 }
  0xb5   :  { %3747 = vmatprep.subr.msk.bf16.mxu0 %vm4839_vm0, %v7062_v7  ;;  %2037 = vmatmul.mubr.f32.gmra.mrb[2].mxu1 %v5233_v17  ;;  %v7136_v17 = vld [vmem:[#allocation46_spill] sm:$0xff] }
  0xb6   :  { %4129 = vmatpush1.bf16.msk.msra.mxu1 %vm4819_vm11, %v7062_v7  ;;  %2042 = vmatprep.mubr.f32.mxu1 %v7069_v3 }
  0xb7   :  { %4131 = vmatprep.subr.msk.bf16.mxu1 %vm4839_vm0, %v7062_v7 }
  0xb8   :  { %3749 = vmatpush1.bf16.msk.msra.mxu0 %vm4859_vm1, %v7062_v7 }
  0xb9   :  { %3751 = vmatprep.subr.msk.bf16.mxu0 %vm4899_vm9, %v7062_v7  ;;  %2045 = vmatmul.mubr.f32.gmra.mrb[4].mxu1 %v5264_v60 }
  0xba   :  { %4133 = vmatpush1.bf16.msk.msra.mxu1 %vm4859_vm1, %v7062_v7  ;;  %2050 = vmatprep.mubr.f32.mxu1 %v7069_v3 }
  0xbb   :  { %4135 = vmatprep.subr.msk.bf16.mxu1 %vm4899_vm9, %v7062_v7 }
  0xbc   :  { %3753 = vmatpush1.bf16.msk.msra.mxu0 %vm4918_vm10, %v7062_v7 }
  0xbd   :  { %3755 = vmatprep.subr.msk.bf16.mxu0 %vm4938_vm2, %v7062_v7  ;;  %2053 = vmatmul.mubr.f32.gmra.mrb[6].mxu1 %v5283_v37 }
  0xbe   :  { %4137 = vmatpush1.bf16.msk.msra.mxu1 %vm4918_vm10, %v7062_v7  ;;  %2123 = vmatprep.mubr.f32.mxu1 %v7069_v3 }
  0xbf   :  { %4139 = vmatprep.subr.msk.bf16.mxu1 %vm4938_vm2, %v7062_v7 }
  0xc0   :  { %3757 = vmatpush1.bf16.msk.msra.mxu0 %vm4954_vm3, %v7062_v7 }
  0xc1   :  { %3759 = vmatprep.subr.msk.bf16.mxu0 %vm7122_vm5, %v7062_v7 }
  0xc2   :  { %4141 = vmatpush1.bf16.msk.msra.mxu1 %vm4954_vm3, %v7062_v7 }
  0xc3   :  { %4143 = vmatprep.subr.msk.bf16.mxu1 %vm7122_vm5, %v7062_v7 }
  0xc4   :  { %3761 = vmatpush1.bf16.msk.msra.mxu0 %vm5010_vm15, %v7062_v7 }
  0xc5   :  { %3763 = vmatprep.subr.msk.bf16.mxu0 %vm7125_vm6, %v7062_v7 }
  0xc6   :  { %4145 = vmatpush1.bf16.msk.msra.mxu1 %vm5010_vm15, %v7062_v7 }
  0xc7   :  { %4147 = vmatprep.subr.msk.bf16.mxu1 %vm7125_vm6, %v7062_v7 }
  0xc8   :  { %3765 = vmatpush1.bf16.msk.msra.mxu0 %vm7127_vm13, %v7062_v7 }
  0xc9   :  { %3767 = vmatprep.subr.msk.bf16.mxu0 %vm5087_vm14, %v7062_v7 }
  0xca   :  { %4149 = vmatpush1.bf16.msk.msra.mxu1 %vm7127_vm13, %v7062_v7 }
  0xcb   :  { %4151 = vmatprep.subr.msk.bf16.mxu1 %vm5087_vm14, %v7062_v7 }
  0xcc   :  { %3769 = vmatpush1.bf16.msk.msra.mxu0 %vm5106_vm12, %v7062_v7 }
  0xcd   :  { %3771 = vmatprep.subr.bf16.mxu0 %v5300_v61 }
  0xce   :  { %4153 = vmatpush1.bf16.msk.msra.mxu1 %vm5106_vm12, %v7062_v7 }
  0xcf   :  { %4155 = vmatprep.subr.bf16.mxu1 %v5300_v61  ;;  %713 = vmatmul.mubr.f32.vlgmr.msra.gmra.mrb[0].mxu0 %v7130_v32  ;;  %v7134_v61 = vld [vmem:[#allocation45_spill] sm:$0xff] }
  0xd0   :  { %3773 = vmatpush1.bf16.msra.mxu0 %v5306_v22  ;;  %847 = vmatprep.mubr.f32.mxu0 %v7069_v3 }
  0xd1   :  { %2127 = vmatmul.mubr.f32.vlgmr.msra.gmra.mrb[0].mxu1 %v7131_v24  ;;  %3775 = vmatprep.subr.bf16.mxu0 %v5312_v15 }
  0xd2   :  { %4157 = vmatpush1.bf16.msra.mxu1 %v5306_v22  ;;  %2132 = vmatprep.mubr.f32.mxu1 %v7069_v3  ;;  %v7135_v22 = vand.u32 4294901760, %v5264_v60  ;;  %v7139_v60 = vld [vmem:[#allocation48_spill] sm:$0xff] }
  0xd3   :  { %4159 = vmatprep.subr.bf16.mxu1 %v5312_v15  ;;  %v7138_v15 = vand.u32 4294901760, %v5283_v37  ;;  %v7142_v37 = vld [vmem:[#allocation15_spill] sm:$0xff] }
  0xd4   :  { %3777 = vmatpush1.bf16.msra.mxu0 %v5318_v19 }
  0xd5   :  { %3779 = vmatprep.subr.bf16.mxu0 %v5324_v43  ;;  %2136 = vmatmul.mubr.f32.gmra.mrb[2].mxu1 %v7132_v63  ;;  %v7164_v63 = vmov 0 }
  0xd6   :  { %4161 = vmatpush1.bf16.msra.mxu1 %v5318_v19  ;;  %2141 = vmatprep.mubr.f32.mxu1 %v7069_v3  ;;  %v7137_v19 = vld [vmem:[#allocation47_spill] sm:$0xff] }
  0xd7   :  { %4163 = vmatprep.subr.bf16.mxu1 %v5324_v43 }
  0xd8   :  { %3781 = vmatpush1.bf16.msra.mxu0 %v7133_v13 }
  0xd9   :  { %3783 = vmatprep.subr.bf16.mxu0 %v7134_v61  ;;  %2145 = vmatmul.mubr.f32.gmra.mrb[4].mxu1 %v7135_v22 }
  0xda   :  { %4165 = vmatpush1.bf16.msra.mxu1 %v7133_v13  ;;  %2150 = vmatprep.mubr.f32.mxu1 %v7069_v3 }
  0xdb   :  { %4167 = vmatprep.subr.bf16.mxu1 %v7134_v61 }
  0xdc   :  { %3785 = vmatpush1.bf16.msra.mxu0 %v7136_v17 }
  0xdd   :  { %3787 = vmatprep.subr.bf16.mxu0 %v7137_v19  ;;  %2154 = vmatmul.mubr.f32.gmra.mrb[6].mxu1 %v7138_v15 }
  0xde   :  { %4169 = vmatpush1.bf16.msra.mxu1 %v7136_v17  ;;  %2288 = vmatprep.mubr.f32.mxu1 %v7069_v3 }
  0xdf   :  { %4171 = vmatprep.subr.bf16.mxu1 %v7137_v19 }
  0xe0   :  { %3789 = vmatpush1.bf16.msra.mxu0 %v7139_v60 }
  0xe1   :  { %3791 = vmatprep.subr.bf16.mxu0 %v5360_v30 }
  0xe2   :  { %4173 = vmatpush1.bf16.msra.mxu1 %v7139_v60 }
  0xe3   :  { %4175 = vmatprep.subr.bf16.mxu1 %v5360_v30  ;;  %v7143_v30 = vld [vmem:[#allocation12_spill] sm:$0xff] }
  0xe4   :  { %3793 = vmatpush1.bf16.msra.mxu0 %v5366_v8 }
  0xe5   :  { %3795 = vmatprep.subr.bf16.mxu0 %v5372_v34 }
  0xe6   :  { %4177 = vmatpush1.bf16.msra.mxu1 %v5366_v8 }
  0xe7   :  { %4179 = vmatprep.subr.bf16.mxu1 %v5372_v34 }
  0xe8   :  { %3797 = vmatpush1.bf16.msra.mxu0 %v5378_v35 }
  0xe9   :  { %3799 = vmatprep.subr.bf16.mxu0 %v5384_v6 }
  0xea   :  { %4181 = vmatpush1.bf16.msra.mxu1 %v5378_v35 }
  0xeb   :  { %4183 = vmatprep.subr.bf16.mxu1 %v5384_v6  ;;  %v7144_v6 = vld [vmem:[#allocation16_spill] sm:$0xff] }
  0xec   :  { %3801 = vmatpush1.bf16.msra.mxu0 %v5387_v12 }
  0xed   :  { %3803 = vmatprep.subr.msk.bf16.mxu0 %vm4766_vm4, %v7062_v7 }
  0xee   :  { %4185 = vmatpush1.bf16.msra.mxu1 %v5387_v12  ;;  %v7145_v12 = vld [vmem:[#allocation17_spill] sm:$0xff] }
  0xef   :  { %4187 = vmatprep.subr.msk.bf16.mxu1 %vm4766_vm4, %v7062_v7  ;;  %849 = vmatmul.mubr.f32.vlgmr.msra.gmra.mrb[0].mxu0 %v5112_v16  ;;  %vm121_vm4 = vcmp.eq.s32.totalorder %v7141_v33, %v7140_v29 }
  0xf0   :  { %3805 = vmatpush1.bf16.msk.msra.mxu0 %vm4783_vm7, %v7062_v7  ;;  %919 = vmatprep.mubr.f32.mxu0 %v7069_v3  ;;  %v153_v43 = vsel %vm121_vm4, 1.0, %v7069_v3 }
  0xf1   :  { %2290 = vmatmul.mubr.f32.vlgmr.msra.gmra.mrb[0].mxu1 %v5126_v2  ;;  %3807 = vmatprep.subr.msk.bf16.mxu0 %vm4797_vm8, %v7062_v7  ;;  %v5762_v54 = vsub.f32 %v153_v43, %v153_v43  ;;  %v7167_v43 = vld [vmem:[#allocation30_spill] sm:$0xff] }
  0xf2   :  { %4189 = vmatpush1.bf16.msk.msra.mxu1 %vm4783_vm7, %v7062_v7  ;;  %2295 = vmatprep.mubr.f32.mxu1 %v7069_v3  ;;  %vm123_vm7 = vcmp.eq.s32.totalorder %v7141_v33, %v7142_v37 }
  0xf3   :  { %4191 = vmatprep.subr.msk.bf16.mxu1 %vm4797_vm8, %v7062_v7  ;;  %v155_v35 = vsel %vm123_vm7, 1.0, %v7069_v3  ;;  %vm120_vm8 = vcmp.eq.s32.totalorder %v7143_v30, %v7140_v29 }
  0xf4   :  { %3809 = vmatpush1.bf16.msk.msra.mxu0 %vm4819_vm11, %v7062_v7  ;;  %v152_v8 = vsel %vm120_vm8, 1.0, %v7069_v3  ;;  %v5764_v56 = vsub.f32 %v155_v35, %v155_v35  ;;  %v7168_v35 = vmov 0 }
  0xf5   :  { %3811 = vmatprep.subr.msk.bf16.mxu0 %vm4839_vm0, %v7062_v7  ;;  %2297 = vmatmul.mubr.f32.gmra.mrb[2].mxu1 %v5227_v59  ;;  %v5766_v57 = vsub.f32 %v152_v8, %v152_v8  ;;  %v7171_v8 = vld [vmem:[#allocation33_spill] sm:$0xff] }
  0xf6   :  { %4193 = vmatpush1.bf16.msk.msra.mxu1 %vm4819_vm11, %v7062_v7  ;;  %2302 = vmatprep.mubr.f32.mxu1 %v7069_v3  ;;  %vm122_vm11 = vcmp.eq.s32.totalorder %v7143_v30, %v7142_v37 }
  0xf7   :  { %4195 = vmatprep.subr.msk.bf16.mxu1 %vm4839_vm0, %v7062_v7  ;;  %v154_v34 = vsel %vm122_vm11, 1.0, %v7069_v3  ;;  %vm125_vm0 = vcmp.eq.s32.totalorder %v7141_v33, %v7144_v6 }
  0xf8   :  { %3813 = vmatpush1.bf16.msk.msra.mxu0 %vm4859_vm1, %v7062_v7  ;;  %v157_v50 = vsel %vm125_vm0, 1.0, %v7069_v3  ;;  %v5775_v20 = vsub.f32 %v154_v34, %v154_v34 }
  0xf9   :  { %3815 = vmatprep.subr.msk.bf16.mxu0 %vm4899_vm9, %v7062_v7  ;;  %2304 = vmatmul.mubr.f32.gmra.mrb[4].mxu1 %v5253_v14  ;;  %v5777_v21 = vsub.f32 %v157_v50, %v157_v50 }
  0xfa   :  { %4197 = vmatpush1.bf16.msk.msra.mxu1 %vm4859_vm1, %v7062_v7  ;;  %2309 = vmatprep.mubr.f32.mxu1 %v7069_v3  ;;  %vm127_vm1 = vcmp.eq.s32.totalorder %v7141_v33, %v7145_v12 }
  0xfb   :  { %4199 = vmatprep.subr.msk.bf16.mxu1 %vm4899_vm9, %v7062_v7  ;;  %v159_v26 = vsel %vm127_vm1, 1.0, %v7069_v3  ;;  %vm124_vm9 = vcmp.eq.s32.totalorder %v7143_v30, %v7144_v6  ;;  %v7172_v6 = vmov 0 }
  0xfc   :  { %3817 = vmatpush1.bf16.msk.msra.mxu0 %vm4918_vm10, %v7062_v7  ;;  %v156_v45 = vsel %vm124_vm9, 1.0, %v7069_v3  ;;  %v5779_v23 = vsub.f32 %v159_v26, %v159_v26  ;;  %v7175_v26 = vld [vmem:[#allocation34_spill] sm:$0xff] }
  0xfd   :  { %3819 = vmatprep.subr.msk.bf16.mxu0 %vm4938_vm2, %v7062_v7  ;;  %2311 = vmatmul.mubr.f32.gmra.mrb[6].mxu1 %v5276_v9  ;;  %v5786_v49 = vsub.f32 %v156_v45, %v156_v45  ;;  %v7176_v45 = vld [vmem:[#allocation35_spill] sm:$0xff] }
  0xfe   :  { %4201 = vmatpush1.bf16.msk.msra.mxu1 %vm4918_vm10, %v7062_v7  ;;  %2381 = vmatprep.mubr.f32.mxu1 %v7069_v3  ;;  %vm126_vm10 = vcmp.eq.s32.totalorder %v7143_v30, %v7145_v12 }
  0xff   :  { %4203 = vmatprep.subr.msk.bf16.mxu1 %vm4938_vm2, %v7062_v7  ;;  %v158_v46 = vsel %vm126_vm10, 1.0, %v7069_v3  ;;  %vm129_vm2 = vcmp.eq.s32.totalorder %v7141_v33, %v7146_v47 }
 0x100   :  { %3821 = vmatpush1.bf16.msk.msra.mxu0 %vm4954_vm3, %v7062_v7  ;;  %v161_v18 = vsel %vm129_vm2, 1.0, %v7069_v3  ;;  %v5788_v1 = vsub.f32 %v158_v46, %v158_v46 }
 0x101   :  { %3823 = vmatprep.subr.msk.bf16.mxu0 %vm7122_vm5, %v7062_v7  ;;  %v5809_v28 = vsub.f32 %v161_v18, %v161_v18 }
 0x102   :  { %4205 = vmatpush1.bf16.msk.msra.mxu1 %vm4954_vm3, %v7062_v7  ;;  %vm5758_vm3 = vmpackc.low %vm123_vm7, %vm121_vm4  ;;  %vm135_vm7 = vcmp.eq.s32.totalorder %v7141_v33, %v7158_v53 }
 0x103   :  { %4207 = vmatprep.subr.msk.bf16.mxu1 %vm7122_vm5, %v7062_v7  ;;  %v7148_v51 = vsel %vm5758_vm3, 4294967295, %v7147_v51  ;;  %vm5805_vm5 = vmpackc.low %vm122_vm11, %vm120_vm8  ;;  %v167_v25 = vsel %vm135_vm7, 1.0, %v7069_v3  ;;  %vm6929_vm8 = vcmp.eq.s32.totalorder %v7143_v30, %v7158_v53  ;;  %vm137_vm11 = vcmp.eq.s32.totalorder %v7141_v33, %v7159_v0 }
 0x104   :  { %3825 = vmatpush1.bf16.msk.msra.mxu0 %vm5010_vm15, %v7062_v7  ;;  %7149 = vst [vmem:[#allocation20_spill] sm:$0xff] %v7148_v51  ;;  %v7152_v5 = vsel %vm5805_vm5, 4294967295, %v7151_v5  ;;  %vm5828_vm4 = vmpackc.low %vm127_vm1, %vm125_vm0  ;;  %vm6932_vm0 = vcmp.eq.s32.totalorder %v7141_v33, %v7160_v62  ;;  %v169_v44 = vsel %vm137_vm11, 1.0, %v7069_v3  ;;  %vm6931_vm1 = vcmp.eq.s32.totalorder %v7143_v30, %v7159_v0 }
 0x105   :  { %3827 = vmatprep.subr.msk.bf16.mxu0 %vm7125_vm6, %v7062_v7  ;;  %7153 = vst [vmem:[#allocation22_spill] sm:$0xff] %v7152_v5  ;;  %v7156_v11 = vsel %vm5828_vm4, 4294967295, %v7155_v11  ;;  %v168_v24 = vsel %vm6931_vm1, 1.0, %v7069_v3  ;;  %v5919_v22 = vsub.f32 %v167_v25, %v167_v25  ;;  %v5929_v15 = vsub.f32 %v169_v44, %v169_v44 }
 0x106   :  { %4209 = vmatpush1.bf16.msk.msra.mxu1 %vm5010_vm15, %v7062_v7  ;;  %vm131_vm15 = vcmp.eq.s32.totalorder %v7141_v33, %v7150_v36  ;;  %7157 = vst [vmem:[#allocation23_spill] sm:$0xff] %v7156_v11  ;;  %v5942_v37 = vsub.f32 %v168_v24, %v168_v24  ;;  %vm6938_vm1 = vcmp.eq.s32.totalorder %v7143_v30, %v7167_v43  ;;  %v6940_v25 = vand.u32 4294901760, %v5762_v54 }
 0x107   :  { %4211 = vmatprep.subr.msk.bf16.mxu1 %vm7125_vm6, %v7062_v7  ;;  %v163_v52 = vsel %vm131_vm15, 1.0, %v7069_v3  ;;  %vm130_vm6 = vcmp.eq.s32.totalorder %v7143_v30, %v7150_v36  ;;  %v6070_v44 = vand.u32 4294901760, %v5425_v48 }
 0x108   :  { %3829 = vmatpush1.bf16.msk.msra.mxu0 %vm7127_vm13, %v7062_v7  ;;  %v162_v10 = vsel %vm130_vm6, 1.0, %v7069_v3  ;;  %v5890_v38 = vsub.f32 %v163_v52, %v163_v52  ;;  %v6027_v52 = vand.u32 4294901760, %v5423_v42 }
 0x109   :  { %3831 = vmatprep.subr.msk.bf16.mxu0 %vm5087_vm14, %v7062_v7  ;;  %v5915_v13 = vsub.f32 %v162_v10, %v162_v10  ;;  %7185 = vst [vmem:[#allocation37_spill] sm:$0xff] %v6070_v44 }
 0x10a   :  { %4213 = vmatpush1.bf16.msk.msra.mxu1 %vm7127_vm13, %v7062_v7  ;;  %vm133_vm13 = vcmp.eq.s32.totalorder %v7141_v33, %v7154_v41 }
 0x10b   :  { %4215 = vmatprep.subr.msk.bf16.mxu1 %vm5087_vm14, %v7062_v7  ;;  %vm128_vm14 = vcmp.eq.s32.totalorder %v7143_v30, %v7146_v47  ;;  %v165_v58 = vsel %vm133_vm13, 1.0, %v7069_v3 }
 0x10c   :  { %3833 = vmatpush1.bf16.msk.msra.mxu0 %vm5106_vm12, %v7062_v7  ;;  %v160_v40 = vsel %vm128_vm14, 1.0, %v7069_v3  ;;  %v5917_v61 = vsub.f32 %v165_v58, %v165_v58 }
 0x10d   :  { %3835 = vmatprep.subr.msk.bf16.mxu0 %vm5758_vm3, %v7062_v7  ;;  %v5892_v32 = vsub.f32 %v160_v40, %v160_v40  ;;  %v7178_v40 = vmov 0 }
 0x10e   :  { %4217 = vmatpush1.bf16.msk.msra.mxu1 %vm5106_vm12, %v7062_v7  ;;  %vm132_vm12 = vcmp.eq.s32.totalorder %v7143_v30, %v7154_v41  ;;  %v7182_v41 = vmov 0 }
 0x10f   :  { %4219 = vmatprep.subr.msk.bf16.mxu1 %vm5758_vm3, %v7062_v7  ;;  %921 = vmatmul.mubr.f32.vlgmr.msra.gmra.mrb[0].mxu0 %v5112_v16  ;;  %v164_v4 = vsel %vm132_vm12, 1.0, %v7069_v3  ;;  %v166_v16 = vsel %vm6929_vm8, 1.0, %v7069_v3  ;;  %vm5886_vm8 = vmpackc.low %vm126_vm10, %vm124_vm9  ;;  %vm6930_vm10 = vcmp.eq.s32.totalorder %v7143_v30, %v7160_v62 }
 0x110   :  { %3837 = vmatpush1.bf16.msk.msra.mxu0 %vm5805_vm5, %v7062_v7  ;;  %991 = vmatprep.mubr.f32.mxu0 %v7069_v3  ;;  %v7162_v27 = vsel %vm5886_vm8, 4294967295, %v7161_v27  ;;  %vm5911_vm9 = vmpackc.low %vm131_vm15, %vm129_vm2  ;;  %v5925_v17 = vsub.f32 %v164_v4, %v164_v4  ;;  %v5927_v19 = vsub.f32 %v166_v16, %v166_v16  ;;  %v170_v29 = vsel %vm6930_vm10, 1.0, %v7069_v3 }
 0x111   :  { %2383 = vmatmul.mubr.f32.vlgmr.msra.gmra.mrb[0].mxu1 %v5126_v2  ;;  %3839 = vmatprep.subr.msk.bf16.mxu0 %vm5828_vm4, %v7062_v7  ;;  %7163 = vst [vmem:[#allocation24_spill] sm:$0xff] %v7162_v27  ;;  %v171_v2 = vsel %vm6932_vm0, 1.0, %v7069_v3  ;;  %v7165_v63 = vsel %vm5911_vm9, 4294967295, %v7164_v63  ;;  %vm141_vm2 = vcmp.eq.s32.totalorder %v7141_v33, %v7167_v43  ;;  %vm5955_vm15 = vmpackc.low %vm130_vm6, %vm128_vm14  ;;  %vm143_vm10 = vcmp.eq.s32.totalorder %v7141_v33, %v7171_v8 }
 0x112   :  { %4221 = vmatpush1.bf16.msk.msra.mxu1 %vm5805_vm5, %v7062_v7  ;;  %7166 = vst [vmem:[#allocation28_spill] sm:$0xff] %v7165_v63  ;;  %2388 = vmatprep.mubr.f32.mxu1 %v7069_v3  ;;  %v5936_v60 = vsub.f32 %v171_v2, %v171_v2  ;;  %v7169_v35 = vsel %vm5955_vm15, 4294967295, %v7168_v35  ;;  %v173_v34 = vsel %vm141_vm2, 1.0, %v7069_v3  ;;  %vm6933_vm0 = vcmp.eq.s32.totalorder %v7143_v30, %v7171_v8  ;;  %vm5979_vm14 = vmpackc.low %vm135_vm7, %vm133_vm13 }
 0x113   :  { %4223 = vmatprep.subr.msk.bf16.mxu1 %vm5828_vm4, %v7062_v7  ;;  %7170 = vst [vmem:[#allocation29_spill] sm:$0xff] %v7169_v35  ;;  %v7173_v6 = vsel %vm5979_vm14, 4294967295, %v7172_v6  ;;  %v175_v12 = vsel %vm143_vm10, 1.0, %v7069_v3  ;;  %v174_v50 = vsel %vm6933_vm0, 1.0, %v7069_v3  ;;  %vm6935_vm6 = vcmp.eq.s32.totalorder %v7141_v33, %v7175_v26 }
 0x114   :  { %3841 = vmatpush1.bf16.msk.msra.mxu0 %vm5886_vm8, %v7062_v7  ;;  %7174 = vst [vmem:[#allocation31_spill] sm:$0xff] %v7173_v6  ;;  %vm6934_vm13 = vcmp.eq.s32.totalorder %v7141_v33, %v7176_v45  ;;  %v177_v46 = vsel %vm6935_vm6, 1.0, %v7069_v3  ;;  %vm6937_vm7 = vcmp.eq.s32.totalorder %v7143_v30, %v7175_v26  ;;  %vm6936_vm0 = vcmp.eq.s32.totalorder %v7143_v30, %v7176_v45 }
 0x115   :  { %3843 = vmatprep.subr.msk.bf16.mxu0 %vm5911_vm9, %v7062_v7  ;;  %2390 = vmatmul.mubr.f32.gmra.mrb[2].mxu1 %v5227_v59  ;;  %v172_v59 = vsel %vm6938_vm1, 1.0, %v7069_v3  ;;  %v179_v47 = vsel %vm6934_vm13, 1.0, %v7069_v3  ;;  %v176_v18 = vsel %vm6937_vm7, 1.0, %v7069_v3  ;;  %v178_v36 = vsel %vm6936_vm0, 1.0, %v7069_v3 }
 0x116   :  { %4225 = vmatpush1.bf16.msk.msra.mxu1 %vm5886_vm8, %v7062_v7  ;;  %2395 = vmatprep.mubr.f32.mxu1 %v7069_v3  ;;  %vm7177_vm13 = vcmp.eq.s32.totalorder %v7143_v30, %v7158_v53  ;;  %v6042_v10 = vsub.f32 %v170_v29, %v170_v29  ;;  %v6044_v58 = vsub.f32 %v173_v34, %v173_v34  ;;  %v6939_v4 = vand.u32 4294901760, %v5764_v56 }
 0x117   :  { %4227 = vmatprep.subr.msk.bf16.mxu1 %vm5911_vm9, %v7062_v7  ;;  %vm6038_vm6 = vmpackc.low %vm7177_vm13, %vm132_vm12  ;;  %vm7181_vm12 = vcmp.eq.s32.totalorder %v7141_v33, %v7160_v62  ;;  %v6062_v53 = vsub.f32 %v175_v12, %v175_v12  ;;  %v6066_v16 = vsub.f32 %v174_v50, %v174_v50  ;;  %v6075_v2 = vsub.f32 %v177_v46, %v177_v46  ;;  %v7186_v12 = vld [vmem:[#allocation38_spill] sm:$0xff] }
 0x118   :  { %3845 = vmatpush1.bf16.msk.msra.mxu0 %vm5955_vm15, %v7062_v7  ;;  %v7179_v40 = vsel %vm6038_vm6, 4294967295, %v7178_v40  ;;  %vm6058_vm13 = vmpackc.low %vm7181_vm12, %vm137_vm11  ;;  %v6077_v24 = vsub.f32 %v179_v47, %v179_v47  ;;  %v6079_v29 = vsub.f32 %v176_v18, %v176_v18  ;;  %v6081_v34 = vsub.f32 %v178_v36, %v178_v36 }
 0x119   :  { %3847 = vmatprep.subr.msk.bf16.mxu0 %vm5979_vm14, %v7062_v7  ;;  %7180 = vst [vmem:[#allocation32_spill] sm:$0xff] %v7179_v40  ;;  %2397 = vmatmul.mubr.f32.gmra.mrb[4].mxu1 %v5253_v14  ;;  %v7183_v41 = vsel %vm6058_vm13, 4294967295, %v7182_v41  ;;  %v6064_v14 = vsub.f32 %v172_v59, %v172_v59  ;;  %vm6948_vm11 = vcmp.eq.s32.totalorder %v7141_v33, %v7186_v12  ;;  %v7190_v47 = vmov 0 }
 0x11a   :  { %4229 = vmatpush1.bf16.msk.msra.mxu1 %vm5955_vm15, %v7062_v7  ;;  %7184 = vst [vmem:[#allocation36_spill] sm:$0xff] %v7183_v41  ;;  %2402 = vmatprep.mubr.f32.mxu1 %v7069_v3  ;;  %v6090_v59 = vsub.f32 %v5423_v42, %v6027_v52  ;;  %vm7188_vm12 = vcmp.eq.s32.totalorder %v7143_v30, %v7159_v0  ;;  %v7193_v42 = vld [vmem:[#allocation41_spill] sm:$0xff]  ;;  %v181_v18 = vsel %vm6948_vm11, 1.0, %v7069_v3  ;;  %v7199_v40 = vand.u32 4294901760, %v5775_v20 }
 0x11b   :  { %4231 = vmatprep.subr.msk.bf16.mxu1 %vm5979_vm14, %v7062_v7  ;;  %vm7189_vm0 = vcmp.eq.s32.totalorder %v7143_v30, %v7160_v62  ;;  %vm6947_vm1 = vcmp.eq.s32.totalorder %v7141_v33, %v7193_v42  ;;  %v1005_v0 = vsub.f32 %v5762_v54, %v6940_v25  ;;  %v1015_v62 = vsub.f32 %v5764_v56, %v6939_v4 }
 0x11c   :  { %3849 = vmatpush1.bf16.msk.msra.mxu0 %vm6038_vm6, %v7062_v7  ;;  %7187 = vst [vmem:[#allocation39_spill] sm:$0xff] %v6090_v59  ;;  %vm6103_vm7 = vmpackc.low %vm7189_vm0, %vm7188_vm12  ;;  %v6136_v36 = vsub.f32 %v5425_v48, %v6070_v44  ;;  %v183_v50 = vsel %vm6947_vm1, 1.0, %v7069_v3  ;;  %v6156_v46 = vsub.f32 %v181_v18, %v181_v18  ;;  %v7198_v4 = vand.u32 4294901760, %v5766_v57 }
 0x11d   :  { %3851 = vmatprep.subr.msk.bf16.mxu0 %vm6058_vm13, %v7062_v7  ;;  %v7191_v47 = vsel %vm6103_vm7, 4294967295, %v7190_v47  ;;  %2404 = vmatmul.mubr.f32.gmra.mrb[6].mxu1 %v5276_v9  ;;  %vm6129_vm0 = vmpackc.low %vm143_vm10, %vm141_vm2  ;;  %v7194_v9 = vmov 0  ;;  %vm6967_vm10 = vcmp.eq.s32.totalorder %v7143_v30, %v7186_v12  ;;  %v1020_v6 = vsub.f32 %v5775_v20, %v7199_v40 }
 0x11e   :  { %7192 = vst [vmem:[#allocation40_spill] sm:$0xff] %v7191_v47  ;;  %4233 = vmatpush1.bf16.msk.msra.mxu1 %vm6038_vm6, %v7062_v7  ;;  %v7195_v9 = vsel %vm6129_vm0, 4294967295, %v7194_v9  ;;  %2474 = vmatprep.mubr.f32.mxu1 %v7069_v3  ;;  %7197 = vst [vmem:[#allocation43_spill] sm:$0xff] %v6136_v36  ;;  %v1010_v41 = vsub.f32 %v5766_v57, %v7198_v4  ;;  %vm7200_vm12 = vcmp.eq.s32.totalorder %v7143_v30, %v7167_v43  ;;  %v7202_v18 = vmov 0 }
 0x11f   :  { %7196 = vst [vmem:[#allocation42_spill] sm:$0xff] %v7195_v9  ;;  %4235 = vmatprep.subr.msk.bf16.mxu1 %vm6058_vm13, %v7062_v7  ;;  %vm7201_vm1 = vcmp.eq.s32.totalorder %v7143_v30, %v7171_v8  ;;  %v180_v4 = vsel %vm6967_vm10, 1.0, %v7069_v3  ;;  %v1006_v40 = vand.u32 4294901760, %v1005_v0  ;;  %v1016_v25 = vand.u32 4294901760, %v1015_v62 }
 0x120   :  { %3853 = vmatpush1.bf16.msk.msra.mxu0 %vm6103_vm7, %v7062_v7  ;;  %vm6174_vm11 = vmpackc.low %vm7201_vm1, %vm7200_vm12  ;;  %v6183_v48 = vand.u32 4294901760, %v5504_v31  ;;  %vm7206_vm1 = vcmp.eq.s32.totalorder %v7141_v33, %v7175_v26  ;;  %vm7207_vm12 = vcmp.eq.s32.totalorder %v7141_v33, %v7176_v45  ;;  %v7208_v43 = vmov 0 }
 0x121   :  { %3855 = vmatprep.subr.msk.bf16.mxu0 %vm6129_vm0, %v7062_v7  ;;  %v7203_v18 = vsel %vm6174_vm11, 4294967295, %v7202_v18  ;;  %vm6194_vm2 = vmpackc.low %vm7207_vm12, %vm7206_vm1  ;;  %v7211_v0 = vand.u32 4294901760, %v5777_v21  ;;  %v7212_v35 = vand.u32 4294901760, %v5779_v23  ;;  %v7213_v63 = vand.u32 4294901760, %v5786_v49 }
 0x122   :  { %7204 = vst [vmem:[#allocation44_spill] sm:$0xff] %v7203_v18  ;;  %7205 = vst [vmem:[#allocation45_spill] sm:$0xff] %v6183_v48  ;;  %4237 = vmatpush1.bf16.msk.msra.mxu1 %vm6103_vm7, %v7062_v7  ;;  %v7209_v43 = vsel %vm6194_vm2, 4294967295, %v7208_v43  ;;  %v6211_v11 = vsub.f32 %v183_v50, %v183_v50  ;;  %vm7214_vm1 = vcmp.eq.s32.totalorder %v7143_v30, %v7193_v42  ;;  %v1011_v9 = vand.u32 4294901760, %v1010_v41 }
 0x123   :  { %7210 = vst [vmem:[#allocation46_spill] sm:$0xff] %v7209_v43  ;;  %v1025_v62 = vsub.f32 %v5777_v21, %v7211_v0  ;;  %v1035_v47 = vsub.f32 %v5779_v23, %v7212_v35  ;;  %v1030_v27 = vsub.f32 %v5786_v49, %v7213_v63  ;;  %4239 = vmatprep.subr.msk.bf16.mxu1 %vm6129_vm0, %v7062_v7  ;;  %v6217_v8 = vsel %vm7214_vm1, 1.0, %v7069_v3 }
 0x124   :  { %v7215_v0 = vand.u32 4294901760, %v5788_v1  ;;  %3857 = vmatpush1.bf16.msk.msra.mxu0 %vm6174_vm11, %v7062_v7  ;;  %v7216_v63 = vand.u32 4294901760, %v6090_v59  ;;  %v1021_v51 = vand.u32 4294901760, %v1020_v6  ;;  %vm7217_vm12 = vcmp.eq.s32.totalorder %v7143_v30, %v7175_v26 }
 0x125   :  { %3859 = vmatprep.subr.msk.bf16.mxu0 %vm6194_vm2, %v7062_v7  ;;  %vm7218_vm1 = vcmp.eq.s32.totalorder %v7143_v30, %v7176_v45  ;;  %v6243_v5 = vsub.f32 %v180_v4, %v180_v4  ;;  %v3866_v41 = vpack.c.bf16 %v1016_v25, %v1006_v40  ;;  %v6247_v6 = vsub.f32 %v5504_v31, %v6183_v48 }
 0x126   :  { %v1040_v35 = vsub.f32 %v5788_v1, %v7215_v0  ;;  %v995_v50 = vsub.f32 %v6090_v59, %v7216_v63  ;;  %vm6239_vm10 = vmpackc.low %vm7218_vm1, %vm7217_vm12  ;;  %v7219_v0 = vmov 0  ;;  %v6250_v63 = vand.u32 4294901760, %v5522_v55  ;;  %4241 = vmatpush1.bf16.msk.msra.mxu1 %vm6174_vm11, %v7062_v7 }
 0x127   :  { %v7220_v0 = vsel %vm6239_vm10, 4294967295, %v7219_v0  ;;  %7222 = vst [vmem:[#allocation48_spill] sm:$0xff] %v6247_v6  ;;  %vm7223_vm12 = vcmp.eq.s32.totalorder %v7141_v33, %v7186_v12  ;;  %vm7224_vm1 = vcmp.eq.s32.totalorder %v7141_v33, %v7193_v42  ;;  %v7225_v26 = vmov 0  ;;  %4243 = vmatprep.subr.msk.bf16.mxu1 %vm6194_vm2, %v7062_v7 }
 0x128   :  { %7221 = vst [vmem:[#allocation47_spill] sm:$0xff] %v7220_v0  ;;  %vm6261_vm0 = vmpackc.low %vm7224_vm1, %vm7223_vm12  ;;  %v7228_v31 = vand.u32 4294901760, %v6136_v36  ;;  %v1026_v25 = vand.u32 4294901760, %v1025_v62  ;;  %v1036_v4 = vand.u32 4294901760, %v1035_v47  ;;  %v1031_v40 = vand.u32 4294901760, %v1030_v27  ;;  %3861 = vmatpush1.bf16.msk.msra.mxu0 %vm6239_vm10, %v7062_v7 }
 0x129   :  { %v7226_v26 = vsel %vm6261_vm0, 4294967295, %v7225_v26  ;;  %v1041_v44 = vand.u32 4294901760, %v1040_v35  ;;  %v7229_v18 = vand.u32 4294901760, %v5809_v28  ;;  %v6980_v59 = vand.u32 4294901760, %v5892_v32  ;;  %3863 = vmatprep.subr.msk.bf16.mxu0 %vm6261_vm0, %v7062_v7 }
 0x12a   :  { %7227 = vst [vmem:[#allocation14_spill] sm:$0xff] %v7226_v26  ;;  %v2478_v45 = vsub.f32 %v6136_v36, %v7228_v31  ;;  %v6981_v48 = vand.u32 4294901760, %v5915_v13  ;;  %v996_v62 = vand.u32 4294901760, %v995_v50  ;;  %v3868_v47 = vpack.c.bf16 %v1021_v51, %v1011_v9  ;;  %4245 = vmatpush1.bf16.msk.msra.mxu1 %vm6239_vm10, %v7062_v7 }
 0x12b   :  { %v1045_v33 = vsub.f32 %v5809_v28, %v7229_v18  ;;  %v7230_v27 = vand.u32 4294901760, %v5890_v38  ;;  %vm7231_vm12 = vcmp.eq.s32.totalorder %v7143_v30, %v7186_v12  ;;  %vm7232_vm1 = vcmp.eq.s32.totalorder %v7143_v30, %v7193_v42  ;;  %4247 = vmatprep.subr.msk.bf16.mxu1 %vm6261_vm0, %v7062_v7 }
 0x12c   :  { %vm6292_vm2 = vmpackc.low %vm7232_vm1, %vm7231_vm12  ;;  %v7233_v18 = vmov 0  ;;  %v6300_v50 = vsub.f32 %v5522_v55, %v6250_v63  ;;  %v2479_v30 = vand.u32 4294901760, %v2478_v45  ;;  %v3870_v12 = vpack.c.bf16 %v1036_v4, %v1026_v25 }
 0x12d   :  { %v1055_v31 = vsub.f32 %v5890_v38, %v7230_v27  ;;  %v7234_v18 = vsel %vm6292_vm2, 4294967295, %v7233_v18  ;;  %v6303_v27 = vand.u32 4294901760, %v5549_v39  ;;  %v3872_v9 = vpack.c.bf16 %v1041_v44, %v1031_v40  ;;  %3865 = vmatpush1.bf16.msk.msra.mxu0 %vm6292_vm2, %v7062_v7 }
 0x12e   :  { %7235 = vst [vmem:[#allocation13_spill] sm:$0xff] %v7234_v18  ;;  %7236 = vst [vmem:[#allocation15_spill] sm:$0xff] %v6300_v50  ;;  %v1046_v55 = vand.u32 4294901760, %v1045_v33  ;;  %v1050_v51 = vsub.f32 %v5892_v32, %v6980_v59  ;;  %v1060_v0 = vsub.f32 %v5915_v13, %v6981_v48  ;;  %v7237_v25 = vand.u32 4294901760, %v5917_v61  ;;  %3867 = vmatprep.subr.bf16.mxu0 %v3866_v41 }
 0x12f   :  { %v1056_v45 = vand.u32 4294901760, %v1055_v31  ;;  %v7238_v33 = vand.u32 4294901760, %v5919_v22  ;;  %v7239_v48 = vand.u32 4294901760, %v6247_v6  ;;  %v6336_v31 = vsub.f32 %v5549_v39, %v6303_v27  ;;  %4249 = vmatpush1.bf16.msk.msra.mxu1 %vm6292_vm2, %v7062_v7 }
 0x130   :  { %v1065_v4 = vsub.f32 %v5917_v61, %v7237_v25  ;;  %v7240_v25 = vand.u32 4294901760, %v5925_v17  ;;  %v6993_v42 = vand.u32 4294901760, %v6042_v10  ;;  %4251 = vmatprep.subr.bf16.mxu1 %v3866_v41  ;;  %997 = vmatmul.mubr.f32.vlgmr.msra.gmra.mrb[0].mxu0 %v996_v62  ;;  %v1051_v39 = vand.u32 4294901760, %v1050_v51 }
 0x131   :  { %v1075_v59 = vsub.f32 %v5919_v22, %v7238_v33  ;;  %v2489_v35 = vsub.f32 %v6247_v6, %v7239_v48  ;;  %v7241_v33 = vand.u32 4294901760, %v5927_v19  ;;  %v1061_v26 = vand.u32 4294901760, %v1060_v0  ;;  %3869 = vmatpush1.bf16.msra.mxu0 %v3868_v47  ;;  %1195 = vmatprep.mubr.f32.mxu0 %v7069_v3 }
 0x132   :  { %v1070_v40 = vsub.f32 %v5925_v17, %v7240_v25  ;;  %v6994_v43 = vand.u32 4294901760, %v6044_v58  ;;  %v3874_v6 = vpack.c.bf16 %v1056_v45, %v1046_v55  ;;  %v1066_v36 = vand.u32 4294901760, %v1065_v4  ;;  %2480 = vmatmul.mubr.f32.vlgmr.msra.gmra.mrb[0].mxu1 %v2479_v30  ;;  %3871 = vmatprep.subr.bf16.mxu0 %v3870_v12 }
 0x133   :  { %v1080_v44 = vsub.f32 %v5927_v19, %v7241_v33  ;;  %v7242_v25 = vand.u32 4294901760, %v5929_v15  ;;  %v7243_v33 = vand.u32 4294901760, %v5936_v60  ;;  %v1076_v0 = vand.u32 4294901760, %v1075_v59  ;;  %4253 = vmatpush1.bf16.msra.mxu1 %v3868_v47  ;;  %2485 = vmatprep.mubr.f32.mxu1 %v7069_v3 }
 0x134   :  { %v2490_v41 = vand.u32 4294901760, %v2489_v35  ;;  %v7244_v62 = vand.u32 4294901760, %v6300_v50  ;;  %v1071_v45 = vand.u32 4294901760, %v1070_v40  ;;  %v1100_v30 = vsub.f32 %v6042_v10, %v6993_v42  ;;  %4255 = vmatprep.subr.bf16.mxu1 %v3870_v12 }
 0x135   :  { %v1085_v7 = vsub.f32 %v5929_v15, %v7242_v25  ;;  %v1095_v48 = vsub.f32 %v5936_v60, %v7243_v33  ;;  %v1081_v4 = vand.u32 4294901760, %v1080_v44  ;;  %v7245_v25 = vand.u32 4294901760, %v5942_v37  ;;  %3873 = vmatpush1.bf16.msra.mxu0 %v3872_v9 }
 0x136   :  { %v2500_v51 = vsub.f32 %v6300_v50, %v7244_v62  ;;  %v1105_v59 = vsub.f32 %v6044_v58, %v6994_v43  ;;  %v7246_v35 = vand.u32 4294901760, %v6062_v53  ;;  %v7005_v40 = vand.u32 4294901760, %v6066_v16  ;;  %3875 = vmatprep.subr.bf16.mxu0 %v3874_v6  ;;  %2491 = vmatmul.mubr.f32.gmra.mrb[2].mxu1 %v2490_v41 }
 0x137   :  { %v1090_v18 = vsub.f32 %v5942_v37, %v7245_v25  ;;  %v3876_v33 = vpack.c.bf16 %v1061_v26, %v1051_v39  ;;  %v1086_v62 = vand.u32 4294901760, %v1085_v7  ;;  %v1096_v25 = vand.u32 4294901760, %v1095_v48  ;;  %4257 = vmatpush1.bf16.msra.mxu1 %v3872_v9  ;;  %2496 = vmatprep.mubr.f32.mxu1 %v7069_v3 }
 0x138   :  { %v1115_v47 = vsub.f32 %v6062_v53, %v7246_v35  ;;  %v7004_v42 = vand.u32 4294901760, %v6075_v2  ;;  %v3878_v12 = vpack.c.bf16 %v1076_v0, %v1066_v36  ;;  %v6997_v55 = vand.u32 4294901760, %v6077_v24  ;;  %4259 = vmatprep.subr.bf16.mxu1 %v3874_v6 }
 0x139   :  { %v2501_v43 = vand.u32 4294901760, %v2500_v51  ;;  %v7247_v50 = vand.u32 4294901760, %v6336_v31  ;;  %v6384_v44 = vsub.f32 %v6217_v8, %v6217_v8  ;;  %v3880_v26 = vpack.c.bf16 %v1081_v4, %v1071_v45  ;;  %3877 = vmatpush1.bf16.msra.mxu0 %v3876_v33 }
 0x13a   :  { %v1091_v7 = vand.u32 4294901760, %v1090_v18  ;;  %v1101_v48 = vand.u32 4294901760, %v1100_v30  ;;  %v1106_v36 = vand.u32 4294901760, %v1105_v59  ;;  %v1116_v39 = vand.u32 4294901760, %v1115_v47  ;;  %3879 = vmatprep.subr.bf16.mxu0 %v3878_v12 }
 0x13b   :  { %v2511_v35 = vsub.f32 %v6336_v31, %v7247_v50  ;;  %v7248_v0 = vand.u32 4294901760, %v6064_v14  ;;  %v1120_v50 = vsub.f32 %v6066_v16, %v7005_v40  ;;  %v3882_v8 = vpack.c.bf16 %v1096_v25, %v1086_v62  ;;  %2502 = vmatmul.mubr.f32.gmra.mrb[4].mxu1 %v2501_v43 }
 0x13c   :  { %v1125_v18 = vsub.f32 %v6075_v2, %v7004_v42  ;;  %v7003_v9 = vand.u32 4294901760, %v6079_v29  ;;  %v7002_v6 = vand.u32 4294901760, %v6081_v34  ;;  %v1135_v51 = vsub.f32 %v6077_v24, %v6997_v55  ;;  %4261 = vmatpush1.bf16.msra.mxu1 %v3876_v33  ;;  %2507 = vmatprep.mubr.f32.mxu1 %v7069_v3 }
 0x13d   :  { %v1110_v41 = vsub.f32 %v6064_v14, %v7248_v0  ;;  %v7001_v45 = vand.u32 4294901760, %v6156_v46  ;;  %v6998_v4 = vand.u32 4294901760, %v6211_v11  ;;  %v2512_v30 = vand.u32 4294901760, %v2511_v35  ;;  %4263 = vmatprep.subr.bf16.mxu1 %v3878_v12  ;;  %3881 = vmatpush1.bf16.msra.mxu0 %v3880_v26 }
 0x13e   :  { %v3884_v59 = vpack.c.bf16 %v1101_v48, %v1091_v7  ;;  %v3886_v47 = vpack.c.bf16 %v1116_v39, %v1106_v36  ;;  %v1121_v25 = vand.u32 4294901760, %v1120_v50  ;;  %v1130_v0 = vsub.f32 %v6079_v29, %v7003_v9  ;;  %3883 = vmatprep.subr.bf16.mxu0 %v3882_v8 }
 0x13f   :  { %v1111_v62 = vand.u32 4294901760, %v1110_v41  ;;  %v1140_v43 = vsub.f32 %v6081_v34, %v7002_v6  ;;  %v7000_v55 = vand.u32 4294901760, %v6243_v5  ;;  %v6999_v33 = vand.u32 4294901760, %v6384_v44  ;;  %2513 = vmatmul.mubr.f32.gmra.mrb[6].mxu1 %v2512_v30 }
 0x140   :  { %v1126_v35 = vand.u32 4294901760, %v1125_v18  ;;  %v1136_v12 = vand.u32 4294901760, %v1135_v51  ;;  %v1145_v7 = vsub.f32 %v6156_v46, %v7001_v45  ;;  %v1155_v48 = vsub.f32 %v6211_v11, %v6998_v4  ;;  %4265 = vmatpush1.bf16.msra.mxu1 %v3880_v26  ;;  %2711 = vmatprep.mubr.f32.mxu1 %v7069_v3 }
 0x141   :  { %4267 = vmatprep.subr.bf16.mxu1 %v3882_v8  ;;  %v3888_v36 = vpack.c.bf16 %v1121_v25, %v1111_v62  ;;  %3885 = vmatpush1.bf16.msra.mxu0 %v3884_v59  ;;  %v1131_v39 = vand.u32 4294901760, %v1130_v0  ;;  %v1141_v41 = vand.u32 4294901760, %v1140_v43  ;;  %v1150_v50 = vsub.f32 %v6243_v5, %v7000_v55 }
 0x142   :  { %v1160_v18 = vsub.f32 %v6384_v44, %v6999_v33  ;;  %3887 = vmatprep.subr.bf16.mxu0 %v3886_v47  ;;  %v3890_v51 = vpack.c.bf16 %v1136_v12, %v1126_v35  ;;  %v1146_v4 = vand.u32 4294901760, %v1145_v7  ;;  %v1156_v30 = vand.u32 4294901760, %v1155_v48  ;;  %v7249_v35 = vld [vmem:[#allocation37_spill] sm:$0xff] }
 0x143   :  { %v3892_v26 = vpack.c.bf16 %v1141_v41, %v1131_v39  ;;  %v1151_v8 = vand.u32 4294901760, %v1150_v50  ;;  %v3898_v43 = vpack.c.bf16 %v5764_v56, %v5762_v54  ;;  %v3906_v12 = vpack.c.bf16 %v5890_v38, %v5809_v28 }
 0x144   :  { %4269 = vmatpush1.bf16.msra.mxu1 %v3884_v59  ;;  %v1161_v62 = vand.u32 4294901760, %v1160_v18  ;;  %v3894_v25 = vpack.c.bf16 %v1156_v30, %v1146_v4  ;;  %v3900_v59 = vpack.c.bf16 %v5775_v20, %v5766_v57  ;;  %v3904_v4 = vpack.c.bf16 %v5788_v1, %v5786_v49 }
 0x145   :  { %4271 = vmatprep.subr.bf16.mxu1 %v3886_v47  ;;  %3889 = vmatpush1.bf16.msra.mxu0 %v3888_v36  ;;  %v3902_v47 = vpack.c.bf16 %v5779_v23, %v5777_v21  ;;  %v3908_v7 = vpack.c.bf16 %v5915_v13, %v5892_v32  ;;  %v3910_v48 = vpack.c.bf16 %v5919_v22, %v5917_v61  ;;  %v7273_v45 = vand.u32 4294901760, %v5762_v54 }
 0x146   :  { %3891 = vmatprep.subr.bf16.mxu0 %v3890_v51  ;;  %v3896_v0 = vpack.c.bf16 %v1161_v62, %v1151_v8  ;;  %v3912_v39 = vpack.c.bf16 %v5927_v19, %v5925_v17  ;;  %v3914_v41 = vpack.c.bf16 %v5936_v60, %v5929_v15  ;;  %v3916_v50 = vpack.c.bf16 %v6042_v10, %v5942_v37 }
 0x147   :  { %v3918_v18 = vpack.c.bf16 %v6062_v53, %v6044_v58  ;;  %v3922_v30 = vpack.c.bf16 %v6077_v24, %v6075_v2  ;;  %v3926_v8 = vpack.c.bf16 %v6211_v11, %v6156_v46  ;;  %v3928_v62 = vpack.c.bf16 %v6384_v44, %v6243_v5 }
 0x148   :  { %4273 = vmatpush1.bf16.msra.mxu1 %v3888_v36  ;;  %v7250_v36 = vld [vmem:[#allocation45_spill] sm:$0xff]  ;;  %v7274_v6 = vand.u32 4294901760, %v5764_v56  ;;  %v7276_v40 = vand.u32 4294901760, %v5766_v57  ;;  %v7278_v56 = vand.u32 4294901760, %v5777_v21  ;;  %v7281_v57 = vand.u32 4294901760, %v5786_v49 }
 0x149   :  { %4275 = vmatprep.subr.bf16.mxu1 %v3890_v51  ;;  %3893 = vmatpush1.bf16.msra.mxu0 %v3892_v26  ;;  %v3920_v51 = vpack.c.bf16 %v6066_v16, %v6064_v14  ;;  %v7286_v49 = vand.u32 4294901760, %v5892_v32  ;;  %v7292_v32 = vand.u32 4294901760, %v5927_v19 }
 0x14a   :  { %3895 = vmatprep.subr.bf16.mxu0 %v3894_v25  ;;  %v3962_v9 = vpack.c.bf16 %v7274_v6, %v7273_v45  ;;  %v7279_v6 = vand.u32 4294901760, %v5779_v23  ;;  %v7284_v23 = vand.u32 4294901760, %v5809_v28 }
 0x14c   :  { %4277 = vmatpush1.bf16.msra.mxu1 %v3892_v26  ;;  %v3924_v26 = vpack.c.bf16 %v6081_v34, %v6079_v29  ;;  %v3966_v45 = vpack.c.bf16 %v7279_v6, %v7278_v56 }
 0x14d   :  { %4279 = vmatprep.subr.bf16.mxu1 %v3894_v25  ;;  %3897 = vmatpush1.bf16.msra.mxu0 %v3896_v0  ;;  %v7251_v25 = vmov 1.0|1.0  }
 0x14e   :  { %3899 = vmatprep.subr.bf16.mxu0 %v3898_v43 }
 0x150   :  { %4281 = vmatpush1.bf16.msra.mxu1 %v3896_v0  ;;  %1197 = vmatmul.mubr.f32.vlgmr.msra.gmra.mrb[0].mxu0 %v6027_v52 }
 0x151   :  { %4283 = vmatprep.subr.bf16.mxu1 %v3898_v43  ;;  %3901 = vmatpush1.bf16.msra.mxu0 %v3900_v59  ;;  %v7253_v43 = vld [vmem:[#allocation39_spill] sm:$0xff] }
 0x152   :  { %1299 = vmatprep.mubr.f32.mxu0 %v7069_v3  ;;  %3903 = vmatprep.subr.bf16.mxu0 %v3902_v47  ;;  %v7280_v55 = vand.u32 4294901760, %v7253_v43 }
 0x153   :  { %2713 = vmatmul.mubr.f32.vlgmr.msra.gmra.mrb[0].mxu1 %v7249_v35 }
 0x154   :  { %4285 = vmatpush1.bf16.msra.mxu1 %v3900_v59  ;;  %2718 = vmatprep.mubr.f32.mxu1 %v7069_v3 }
 0x155   :  { %4287 = vmatprep.subr.bf16.mxu1 %v3902_v47  ;;  %3905 = vmatpush1.bf16.msra.mxu0 %v3904_v4  ;;  %v7255_v47 = vld [vmem:[#allocation43_spill] sm:$0xff] }
 0x156   :  { %3907 = vmatprep.subr.bf16.mxu0 %v3906_v12  ;;  %v7283_v21 = vand.u32 4294901760, %v7255_v47 }
 0x157   :  { %2720 = vmatmul.mubr.f32.gmra.mrb[2].mxu1 %v7250_v36 }
 0x158   :  { %4289 = vmatpush1.bf16.msra.mxu1 %v3904_v4  ;;  %2725 = vmatprep.mubr.f32.mxu1 %v7069_v3 }
 0x159   :  { %4291 = vmatprep.subr.bf16.mxu1 %v3906_v12  ;;  %3909 = vmatpush1.bf16.msra.mxu0 %v3908_v7 }
 0x15a   :  { %3911 = vmatprep.subr.bf16.mxu0 %v3910_v48 }
 0x15b   :  { %2727 = vmatmul.mubr.f32.gmra.mrb[4].mxu1 %v6250_v63 }
 0x15c   :  { %4293 = vmatpush1.bf16.msra.mxu1 %v3908_v7  ;;  %2732 = vmatprep.mubr.f32.mxu1 %v7069_v3 }
 0x15d   :  { %4295 = vmatprep.subr.bf16.mxu1 %v3910_v48  ;;  %3913 = vmatpush1.bf16.msra.mxu0 %v3912_v39  ;;  %v7259_v48 = vld [vmem:[#allocation48_spill] sm:$0xff] }
 0x15e   :  { %3915 = vmatprep.subr.bf16.mxu0 %v3914_v41  ;;  %v7290_v28 = vand.u32 4294901760, %v7259_v48 }
 0x15f   :  { %2734 = vmatmul.mubr.f32.gmra.mrb[6].mxu1 %v6303_v27 }
 0x160   :  { %4297 = vmatpush1.bf16.msra.mxu1 %v3912_v39  ;;  %2836 = vmatprep.mubr.f32.mxu1 %v7069_v3 }
 0x161   :  { %4299 = vmatprep.subr.bf16.mxu1 %v3914_v41  ;;  %3917 = vmatpush1.bf16.msra.mxu0 %v3916_v50 }
 0x162   :  { %3919 = vmatprep.subr.bf16.mxu0 %v3918_v18 }
 0x164   :  { %4301 = vmatpush1.bf16.msra.mxu1 %v3916_v50  ;;  %v7262_v50 = vld [vmem:[#allocation15_spill] sm:$0xff] }
 0x165   :  { %4303 = vmatprep.subr.bf16.mxu1 %v3918_v18  ;;  %3921 = vmatpush1.bf16.msra.mxu0 %v3920_v51  ;;  %v7295_v6 = vand.u32 4294901760, %v7262_v50 }
 0x166   :  { %3923 = vmatprep.subr.bf16.mxu0 %v3922_v30 }
 0x168   :  { %4305 = vmatpush1.bf16.msra.mxu1 %v3920_v51 }
 0x169   :  { %4307 = vmatprep.subr.bf16.mxu1 %v3922_v30  ;;  %3925 = vmatpush1.bf16.msra.mxu0 %v3924_v26 }
 0x16a   :  { %3927 = vmatprep.subr.bf16.mxu0 %v3926_v8 }
 0x16c   :  { %4309 = vmatpush1.bf16.msra.mxu1 %v3924_v26  ;;  %v7266_v26 = vld [vmem:[#allocation42_spill] sm:$0xff] }
 0x16d   :  { %4311 = vmatprep.subr.bf16.mxu1 %v3926_v8  ;;  %3929 = vmatpush1.bf16.msra.mxu0 %v3928_v62  ;;  %vm7267_vm12 = vnez %v7266_v26 }
 0x16e   :  { %3931 = vmatprep.subr.msk.bf16.mxu0 %vm5758_vm3, %v7251_v25 }
 0x170   :  { %4313 = vmatpush1.bf16.msra.mxu1 %v3928_v62  ;;  %1302 = vmatmul.mubr.f32.vlgmr.msra.gmra.mrb[0].mxu0 %v7253_v43  ;;  %v7269_v62 = vld [vmem:[#allocation46_spill] sm:$0xff]  ;;  %v7288_v43 = vand.u32 4294901760, %v5917_v61  ;;  %v7294_v61 = vand.u32 4294901760, %v5936_v60 }
 0x171   :  { %4315 = vmatprep.subr.msk.bf16.mxu1 %vm5758_vm3, %v7251_v25  ;;  %3933 = vmatpush1.bf16.msk.msra.mxu0 %vm5805_vm5, %v7251_v25  ;;  %vm7270_vm1 = vnez %v7269_v62  ;;  %v7277_v62 = vand.u32 4294901760, %v5775_v20  ;;  %v7282_v20 = vand.u32 4294901760, %v5788_v1  ;;  %v7287_v1 = vand.u32 4294901760, %v5915_v13 }
 0x172   :  { %1372 = vmatprep.mubr.f32.mxu0 %v7069_v3  ;;  %3935 = vmatprep.subr.msk.bf16.mxu0 %vm5828_vm4, %v7251_v25 }
 0x173   :  { %2839 = vmatmul.mubr.f32.vlgmr.msra.gmra.mrb[0].mxu1 %v7255_v47  ;;  %v3964_v54 = vpack.c.bf16 %v7277_v62, %v7276_v40  ;;  %v3968_v40 = vpack.c.bf16 %v7282_v20, %v7281_v57  ;;  %v7285_v62 = vand.u32 4294901760, %v5890_v38  ;;  %v7289_v47 = vand.u32 4294901760, %v5919_v22 }
 0x174   :  { %4317 = vmatpush1.bf16.msk.msra.mxu1 %vm5805_vm5, %v7251_v25  ;;  %2844 = vmatprep.mubr.f32.mxu1 %v7069_v3  ;;  %v7291_v38 = vand.u32 4294901760, %v5925_v17  ;;  %v7297_v17 = vand.u32 4294901760, %v6042_v10  ;;  %v7300_v57 = vand.u32 4294901760, %v6336_v31  ;;  %v7303_v20 = vand.u32 4294901760, %v6075_v2 }
 0x175   :  { %4319 = vmatprep.subr.msk.bf16.mxu1 %vm5828_vm4, %v7251_v25  ;;  %3937 = vmatpush1.bf16.msk.msra.mxu0 %vm5886_vm8, %v7251_v25  ;;  %v3974_v56 = vpack.c.bf16 %v7289_v47, %v7288_v43  ;;  %v7309_v2 = vand.u32 4294901760, %v6243_v5 }
 0x176   :  { %3939 = vmatprep.subr.msk.bf16.mxu0 %vm5911_vm9, %v7251_v25  ;;  %v3976_v13 = vpack.c.bf16 %v7292_v32, %v7291_v38 }
 0x177   :  { %2847 = vmatmul.mubr.f32.gmra.mrb[2].mxu1 %v7259_v48  ;;  %v7296_v48 = vand.u32 4294901760, %v5942_v37  ;;  %v7302_v37 = vand.u32 4294901760, %v6066_v16  ;;  %v7308_v16 = vand.u32 4294901760, %v6211_v11 }
 0x178   :  { %4321 = vmatpush1.bf16.msk.msra.mxu1 %vm5886_vm8, %v7251_v25  ;;  %2852 = vmatprep.mubr.f32.mxu1 %v7069_v3 }
 0x179   :  { %4323 = vmatprep.subr.msk.bf16.mxu1 %vm5911_vm9, %v7251_v25  ;;  %3941 = vmatpush1.bf16.msk.msra.mxu0 %vm5955_vm15, %v7251_v25  ;;  %v3980_v19 = vpack.c.bf16 %v7297_v17, %v7296_v48 }
 0x17a   :  { %3943 = vmatprep.subr.msk.bf16.mxu0 %vm5979_vm14, %v7251_v25 }
 0x17b   :  { %2855 = vmatmul.mubr.f32.gmra.mrb[4].mxu1 %v7262_v50  ;;  %v7301_v50 = vand.u32 4294901760, %v6064_v14  ;;  %v7307_v14 = vand.u32 4294901760, %v6156_v46 }
 0x17c   :  { %4325 = vmatpush1.bf16.msk.msra.mxu1 %vm5955_vm15, %v7251_v25  ;;  %2860 = vmatprep.mubr.f32.mxu1 %v7069_v3 }
 0x17d   :  { %4327 = vmatprep.subr.msk.bf16.mxu1 %vm5979_vm14, %v7251_v25  ;;  %3945 = vmatpush1.bf16.msk.msra.mxu0 %vm6038_vm6, %v7251_v25  ;;  %v3984_v10 = vpack.c.bf16 %v7302_v37, %v7301_v50 }
 0x17e   :  { %3947 = vmatprep.subr.msk.bf16.mxu0 %vm6058_vm13, %v7251_v25 }
 0x17f   :  { %2863 = vmatmul.mubr.f32.gmra.mrb[6].mxu1 %v6336_v31  ;;  %v7305_v31 = vand.u32 4294901760, %v6079_v29 }
 0x180   :  { %4329 = vmatpush1.bf16.msk.msra.mxu1 %vm6038_vm6, %v7251_v25  ;;  %2933 = vmatprep.mubr.f32.mxu1 %v7069_v3 }
 0x181   :  { %4331 = vmatprep.subr.msk.bf16.mxu1 %vm6058_vm13, %v7251_v25  ;;  %3949 = vmatpush1.bf16.msk.msra.mxu0 %vm6103_vm7, %v7251_v25 }
 0x182   :  { %3951 = vmatprep.subr.msk.bf16.mxu0 %vm7267_vm12, %v7251_v25 }
 0x184   :  { %4333 = vmatpush1.bf16.msk.msra.mxu1 %vm6103_vm7, %v7251_v25 }
 0x185   :  { %4335 = vmatprep.subr.msk.bf16.mxu1 %vm7267_vm12, %v7251_v25  ;;  %3953 = vmatpush1.bf16.msk.msra.mxu0 %vm6174_vm11, %v7251_v25 }
 0x186   :  { %3955 = vmatprep.subr.msk.bf16.mxu0 %vm7270_vm1, %v7251_v25 }
 0x188   :  { %4337 = vmatpush1.bf16.msk.msra.mxu1 %vm6174_vm11, %v7251_v25 }
 0x189   :  { %4339 = vmatprep.subr.msk.bf16.mxu1 %vm7270_vm1, %v7251_v25  ;;  %3957 = vmatpush1.bf16.msk.msra.mxu0 %vm6239_vm10, %v7251_v25 }
 0x18a   :  { %3959 = vmatprep.subr.msk.bf16.mxu0 %vm6261_vm0, %v7251_v25 }
 0x18c   :  { %4341 = vmatpush1.bf16.msk.msra.mxu1 %vm6239_vm10, %v7251_v25 }
 0x18d   :  { %4343 = vmatprep.subr.msk.bf16.mxu1 %vm6261_vm0, %v7251_v25  ;;  %3961 = vmatpush1.bf16.msk.msra.mxu0 %vm6292_vm2, %v7251_v25 }
 0x18e   :  { %3963 = vmatprep.subr.bf16.mxu0 %v3962_v9 }
 0x190   :  { %4345 = vmatpush1.bf16.msk.msra.mxu1 %vm6292_vm2, %v7251_v25  ;;  %1376 = vmatmul.mubr.f32.vlgmr.msra.gmra.mrb[0].mxu0 %v7280_v55  ;;  %v3972_v55 = vpack.c.bf16 %v7287_v1, %v7286_v49 }
 0x191   :  { %4347 = vmatprep.subr.bf16.mxu1 %v3962_v9  ;;  %3965 = vmatpush1.bf16.msra.mxu0 %v3964_v54  ;;  %v3970_v9 = vpack.c.bf16 %v7285_v62, %v7284_v23  ;;  %v3990_v23 = vpack.c.bf16 %v7308_v16, %v7307_v14 }
 0x192   :  { %1510 = vmatprep.mubr.f32.mxu0 %v7069_v3  ;;  %3967 = vmatprep.subr.bf16.mxu0 %v3966_v45 }
 0x193   :  { %2937 = vmatmul.mubr.f32.vlgmr.msra.gmra.mrb[0].mxu1 %v7283_v21 }
 0x194   :  { %4349 = vmatpush1.bf16.msra.mxu1 %v3964_v54  ;;  %2942 = vmatprep.mubr.f32.mxu1 %v7069_v3  ;;  %v7293_v54 = vand.u32 4294901760, %v5929_v15  ;;  %v7299_v15 = vand.u32 4294901760, %v6062_v53 }
 0x195   :  { %4351 = vmatprep.subr.bf16.mxu1 %v3966_v45  ;;  %3969 = vmatpush1.bf16.msra.mxu0 %v3968_v40  ;;  %v7298_v45 = vand.u32 4294901760, %v6044_v58  ;;  %v7304_v58 = vand.u32 4294901760, %v6077_v24  ;;  %v7310_v24 = vand.u32 4294901760, %v6384_v44 }
 0x196   :  { %3971 = vmatprep.subr.bf16.mxu0 %v3970_v9  ;;  %v3978_v22 = vpack.c.bf16 %v7294_v61, %v7293_v54 }
 0x197   :  { %2946 = vmatmul.mubr.f32.gmra.mrb[2].mxu1 %v7290_v28  ;;  %v3982_v60 = vpack.c.bf16 %v7299_v15, %v7298_v45  ;;  %v3986_v53 = vpack.c.bf16 %v7304_v58, %v7303_v20  ;;  %v3992_v62 = vpack.c.bf16 %v7310_v24, %v7309_v2 }
 0x198   :  { %4353 = vmatpush1.bf16.msra.mxu1 %v3968_v40  ;;  %2951 = vmatprep.mubr.f32.mxu1 %v7069_v3  ;;  %v7306_v40 = vand.u32 4294901760, %v6081_v34 }
 0x199   :  { %4355 = vmatprep.subr.bf16.mxu1 %v3970_v9  ;;  %3973 = vmatpush1.bf16.msra.mxu0 %v3972_v55 }
 0x19a   :  { %3975 = vmatprep.subr.bf16.mxu0 %v3974_v56  ;;  %v3988_v21 = vpack.c.bf16 %v7306_v40, %v7305_v31 }
 0x19b   :  { %2955 = vmatmul.mubr.f32.gmra.mrb[4].mxu1 %v7295_v6 }
 0x19c   :  { %4357 = vmatpush1.bf16.msra.mxu1 %v3972_v55  ;;  %2960 = vmatprep.mubr.f32.mxu1 %v7069_v3 }
 0x19d   :  { %4359 = vmatprep.subr.bf16.mxu1 %v3974_v56  ;;  %3977 = vmatpush1.bf16.msra.mxu0 %v3976_v13 }
 0x19e   :  { %3979 = vmatprep.subr.bf16.mxu0 %v3978_v22 }
 0x19f   :  { %2964 = vmatmul.mubr.f32.gmra.mrb[6].mxu1 %v7300_v57 }
 0x1a0   :  { %4361 = vmatpush1.bf16.msra.mxu1 %v3976_v13  ;;  %3098 = vmatprep.mubr.f32.mxu1 %v7069_v3 }
 0x1a1   :  { %4363 = vmatprep.subr.bf16.mxu1 %v3978_v22  ;;  %3981 = vmatpush1.bf16.msra.mxu0 %v3980_v19 }
 0x1a2   :  { %3983 = vmatprep.subr.bf16.mxu0 %v3982_v60 }
 0x1a4   :  { %4365 = vmatpush1.bf16.msra.mxu1 %v3980_v19 }
 0x1a5   :  { %4367 = vmatprep.subr.bf16.mxu1 %v3982_v60  ;;  %3985 = vmatpush1.bf16.msra.mxu0 %v3984_v10 }
 0x1a6   :  { %3987 = vmatprep.subr.bf16.mxu0 %v3986_v53 }
 0x1a8   :  { %4369 = vmatpush1.bf16.msra.mxu1 %v3984_v10 }
 0x1a9   :  { %4371 = vmatprep.subr.bf16.mxu1 %v3986_v53  ;;  %3989 = vmatpush1.bf16.msra.mxu0 %v3988_v21 }
 0x1aa   :  { %3991 = vmatprep.subr.bf16.mxu0 %v3990_v23 }
 0x1ac   :  { %4373 = vmatpush1.bf16.msra.mxu1 %v3988_v21 }
 0x1ad   :  { %4375 = vmatprep.subr.bf16.mxu1 %v3990_v23  ;;  %3993 = vmatpush1.bf16.msra.mxu0 %v3992_v62 }
 0x1ae   :  { %3995 = vmatprep.subr.msk.bf16.mxu0 %vm5758_vm3, %v7251_v25 }
 0x1b0   :  { %4377 = vmatpush1.bf16.msra.mxu1 %v3992_v62  ;;  %1512 = vmatmul.mubr.f32.vlgmr.msra.gmra.mrb[0].mxu0 %v6027_v52 }
 0x1b1   :  { %4379 = vmatprep.subr.msk.bf16.mxu1 %vm5758_vm3, %v7251_v25  ;;  %3997 = vmatpush1.bf16.msk.msra.mxu0 %vm5805_vm5, %v7251_v25 }
 0x1b2   :  { %1582 = vmatprep.mubr.f32.mxu0 %v7069_v3  ;;  %3999 = vmatprep.subr.msk.bf16.mxu0 %vm5828_vm4, %v7251_v25 }
 0x1b3   :  { %3100 = vmatmul.mubr.f32.vlgmr.msra.gmra.mrb[0].mxu1 %v7249_v35 }
 0x1b4   :  { %4381 = vmatpush1.bf16.msk.msra.mxu1 %vm5805_vm5, %v7251_v25  ;;  %3105 = vmatprep.mubr.f32.mxu1 %v7069_v3 }
 0x1b5   :  { %4383 = vmatprep.subr.msk.bf16.mxu1 %vm5828_vm4, %v7251_v25  ;;  %4001 = vmatpush1.bf16.msk.msra.mxu0 %vm5886_vm8, %v7251_v25 }
 0x1b6   :  { %4003 = vmatprep.subr.msk.bf16.mxu0 %vm5911_vm9, %v7251_v25 }
 0x1b7   :  { %3107 = vmatmul.mubr.f32.gmra.mrb[2].mxu1 %v7250_v36 }
 0x1b8   :  { %4385 = vmatpush1.bf16.msk.msra.mxu1 %vm5886_vm8, %v7251_v25  ;;  %3112 = vmatprep.mubr.f32.mxu1 %v7069_v3 }
 0x1b9   :  { %4387 = vmatprep.subr.msk.bf16.mxu1 %vm5911_vm9, %v7251_v25  ;;  %4005 = vmatpush1.bf16.msk.msra.mxu0 %vm5955_vm15, %v7251_v25 }
 0x1ba   :  { %4007 = vmatprep.subr.msk.bf16.mxu0 %vm5979_vm14, %v7251_v25 }
 0x1bb   :  { %3114 = vmatmul.mubr.f32.gmra.mrb[4].mxu1 %v6250_v63 }
 0x1bc   :  { %4389 = vmatpush1.bf16.msk.msra.mxu1 %vm5955_vm15, %v7251_v25  ;;  %3119 = vmatprep.mubr.f32.mxu1 %v7069_v3 }
 0x1bd   :  { %4391 = vmatprep.subr.msk.bf16.mxu1 %vm5979_vm14, %v7251_v25  ;;  %4009 = vmatpush1.bf16.msk.msra.mxu0 %vm6038_vm6, %v7251_v25 }
 0x1be   :  { %4011 = vmatprep.subr.msk.bf16.mxu0 %vm6058_vm13, %v7251_v25 }
 0x1bf   :  { %3121 = vmatmul.mubr.f32.gmra.mrb[6].mxu1 %v6303_v27 }
 0x1c0   :  { %4393 = vmatpush1.bf16.msk.msra.mxu1 %vm6038_vm6, %v7251_v25  ;;  %3191 = vmatprep.mubr.f32.mxu1 %v7069_v3 }
 0x1c1   :  { %4395 = vmatprep.subr.msk.bf16.mxu1 %vm6058_vm13, %v7251_v25  ;;  %4013 = vmatpush1.bf16.msk.msra.mxu0 %vm6103_vm7, %v7251_v25 }
 0x1c2   :  { %4015 = vmatprep.subr.msk.bf16.mxu0 %vm7267_vm12, %v7251_v25 }
 0x1c4   :  { %4397 = vmatpush1.bf16.msk.msra.mxu1 %vm6103_vm7, %v7251_v25 }
 0x1c5   :  { %4399 = vmatprep.subr.msk.bf16.mxu1 %vm7267_vm12, %v7251_v25  ;;  %4017 = vmatpush1.bf16.msk.msra.mxu0 %vm6174_vm11, %v7251_v25 }
 0x1c6   :  { %4019 = vmatprep.subr.msk.bf16.mxu0 %vm7270_vm1, %v7251_v25 }
 0x1c8   :  { %4401 = vmatpush1.bf16.msk.msra.mxu1 %vm6174_vm11, %v7251_v25 }
 0x1c9   :  { %4403 = vmatprep.subr.msk.bf16.mxu1 %vm7270_vm1, %v7251_v25  ;;  %4021 = vmatpush1.bf16.msk.msra.mxu0 %vm6239_vm10, %v7251_v25 }
 0x1ca   :  { %4023 = vmatprep.subr.msk.bf16.mxu0 %vm6261_vm0, %v7251_v25 }
 0x1cc   :  { %4405 = vmatpush1.bf16.msk.msra.mxu1 %vm6239_vm10, %v7251_v25 }
 0x1cd   :  { %4407 = vmatprep.subr.msk.bf16.mxu1 %vm6261_vm0, %v7251_v25  ;;  %4025 = vmatpush1.bf16.msk.msra.mxu0 %vm6292_vm2, %v7251_v25 }
 0x1d0   :  { %4409 = vmatpush1.bf16.msk.msra.mxu1 %vm6292_vm2, %v7251_v25  ;;  %1584 = vmatmul.mubr.f32.vlgmr.msra.gmra.mrb[0].mxu0 %v6027_v52 }
 0x1d3   :  { %3193 = vmatmul.mubr.f32.vlgmr.msra.gmra.mrb[0].mxu1 %v7249_v35 }
 0x1d4   :  { %3198 = vmatprep.mubr.f32.mxu1 %v7069_v3 }
 0x1d7   :  { %3200 = vmatmul.mubr.f32.gmra.mrb[2].mxu1 %v7250_v36 }
 0x1d8   :  { %3205 = vmatprep.mubr.f32.mxu1 %v7069_v3 }
 0x1db   :  { %3207 = vmatmul.mubr.f32.gmra.mrb[4].mxu1 %v6250_v63 }
 0x1dc   :  { %3212 = vmatprep.mubr.f32.mxu1 %v7069_v3 }
 0x1df   :  { %3214 = vmatmul.mubr.f32.gmra.mrb[6].mxu1 %v6303_v27 }
 0x1e0   :  { %4605 = shalt.err (!%p4602_p0)
}
 0x1e1   :  { %s4606_s14 = scalar_lea.hbm %s6815_s4, 256 }
 0x1e2   :  { %p4607_p1 = scmp.ne.s32.totalorder %s6815_s4, %s4606_s14  ;;  %p4610_p2 = scmp.lt.u32.totalorder %s4606_s14, %s6815_s4 }
 0x1e4   :  { %p4612_p3 = pnand %p4610_p2, %p4607_p1 }
 0x1e6   :  { %4615 = shalt.err (!%p4612_p3)
}
 0x1e7   :  { %3239 = dma.vmem_to_hbm [thread:$0]  %s3234_s8, 256, %s6815_s4, [#allocation4], %s4623_s11, %s4623_s11, %s4624_s12  }
 0x2a3   :  { %v1585_v3 = vpop.f32.mrb[0].mxu0 }
 0x2a4   :  { %1590 = vst [vmem:[%s6816_s5] sm:$0xff] %v1585_v3  ;;  %v1587_v52 = vpop.f32.mrb[1].mxu0 }
 0x2a5   :  { %1591 = vst [vmem:[%s6816_s5 + $0x8] sm:$0xff] %v1587_v52 }
 0x2a6   :  { %v3194_v29 = vpop.f32.mrb[0].mxu1 }
 0x2a7   :  { %3220 = vst [vmem:[%s6818_s7] sm:$0xff] %v3194_v29  ;;  %v3196_v34 = vpop.f32.mrb[1].mxu1 }
 0x2a8   :  { %3221 = vst [vmem:[%s6818_s7 + $0x8] sm:$0xff] %v3196_v34 }
 0x2aa   :  { %v3201_v46 = vpop.f32.mrb[2].mxu1 }
 0x2ab   :  { %3222 = vst [vmem:[%s6818_s7 + $0x10] sm:$0xff] %v3201_v46  ;;  %v3203_v63 = vpop.f32.mrb[3].mxu1 }
 0x2ac   :  { %3223 = vst [vmem:[%s6818_s7 + $0x18] sm:$0xff] %v3203_v63 }
 0x2ae   :  { %v3208_v27 = vpop.f32.mrb[4].mxu1 }
 0x2af   :  { %3224 = vst [vmem:[%s6818_s7 + $0x20] sm:$0xff] %v3208_v27  ;;  %v3210_v42 = vpop.f32.mrb[5].mxu1 }
 0x2b0   :  { %3225 = vst [vmem:[%s6818_s7 + $0x28] sm:$0xff] %v3210_v42 }
 0x2b2   :  { %v3215_v44 = vpop.f32.mrb[6].mxu1 }
 0x2b3   :  { %3226 = vst [vmem:[%s6818_s7 + $0x30] sm:$0xff] %v3215_v44  ;;  %v3217_v33 = vpop.f32.mrb[7].mxu1 }
 0x2b4   :  { %3227 = vst [vmem:[%s6818_s7 + $0x38] sm:$0xff] %v3217_v33 }
 0x2b5   :  { %4620 = dma.done.wait [#allocation4], 256  }
 0x2b6   :  { %4621 = vsyncadd [#allocation4], 4294967040 }
 0x2b7   :  { %3255 = vsyncpa [#allocation3], 1 }
 0x2b8   :  { %3256 = vsyncpa [#allocation6], 1 }
 0x2b9   :  { %3257 = vsyncpa [#allocation4], 1 }

</bundles_post_ra>
